<compile_context>
chip_gen: v7x
topology: tpu7x:2x2x1
jax: 0.10.0
libtpu: 0.0.40
codegen_flags: <defaults>
</compile_context>

<pallas_src>
import functools
import math

import jax
import jax.numpy as jnp
from jax.experimental import pallas as pl
from jax.experimental.pallas import tpu as pltpu


# --------------------------------------------------------------------------- helpers

def _pick_tile(dim, pref):
    """Use `pref` if it evenly divides `dim`, else fall back to the full dimension."""
    return pref if (dim >= pref and dim % pref == 0) else dim


def _gelu(x):
    # tanh-approximate GELU (EUP tanh inside the kernel).
    # TODO(synk): OpenCLIP's nn.GELU() is the exact erf form; tanh approximation used here.
    c = math.sqrt(2.0 / math.pi)
    return 0.5 * x * (1.0 + jnp.tanh(c * (x + 0.044715 * x * x * x)))


# --------------------------------------------------------------------------- matmul kernels

def _linear_kernel_nogrid(x_ref, w_ref, b_ref, o_ref, *, activation):
    out = jnp.dot(x_ref[...].astype(jnp.bfloat16),
                  w_ref[...].astype(jnp.bfloat16),
                  preferred_element_type=jnp.float32) + b_ref[...]
    if activation == "gelu":
        out = _gelu(out)
    o_ref[...] = out


def _linear_kernel_grid(x_ref, w_ref, b_ref, o_ref, acc_ref, *, activation):
    k = pl.program_id(2)

    @pl.when(k == 0)
    def _():
        acc_ref[...] = jnp.zeros_like(acc_ref)

    acc_ref[...] += jnp.dot(x_ref[...].astype(jnp.bfloat16),
                            w_ref[...].astype(jnp.bfloat16),
                            preferred_element_type=jnp.float32)

    @pl.when(k == pl.num_programs(2) - 1)
    def _():
        out = acc_ref[...] + b_ref[...]
        if activation == "gelu":
            out = _gelu(out)
        o_ref[...] = out


def linear_pallas(x, w, b=None, activation=None):
    """y = act(x @ w + b), x:(M,K) f32, w:(K,N) f32, b:(N,) or None -> (M,N) f32."""
    M, K = x.shape
    K2, N = w.shape
    assert K == K2
    if b is None:
        b = jnp.zeros((N,), jnp.float32)
    x = x.astype(jnp.float32)
    w = w.astype(jnp.float32)
    b2 = b.reshape(1, N).astype(jnp.float32)

    tm = _pick_tile(M, 256)
    tn = _pick_tile(N, 256)
    tk = _pick_tile(K, 256)
    nm, nn, nk = M // tm, N // tn, K // tk

    if nm * nn * nk == 1:
        # Whole problem fits one VMEM tile: single invocation, no grid pipeline step.
        return pl.pallas_call(
            functools.partial(_linear_kernel_nogrid, activation=activation),
            out_shape=jax.ShapeDtypeStruct((M, N), jnp.float32),
        )(x, w, b2)

    return pl.pallas_call(
        functools.partial(_linear_kernel_grid, activation=activation),
        out_shape=jax.ShapeDtypeStruct((M, N), jnp.float32),
        grid=(nm, nn, nk),
        in_specs=[
            pl.BlockSpec((tm, tk), lambda i, j, k: (i, k)),
            pl.BlockSpec((tk, tn), lambda i, j, k: (k, j)),
            pl.BlockSpec((1, tn), lambda i, j, k: (0, j)),
        ],
        out_specs=pl.BlockSpec((tm, tn), lambda i, j, k: (i, j)),
        scratch_shapes=[pltpu.VMEM((tm, tn), jnp.float32)],
        compiler_params=pltpu.CompilerParams(
            dimension_semantics=("parallel", "parallel", "arbitrary")),
    )(x, w, b2)


# --------------------------------------------------------------------------- layernorm kernel

def _layernorm_kernel(x_ref, g_ref, b_ref, o_ref, *, eps):
    x = x_ref[...]
    mean = jnp.mean(x, axis=-1, keepdims=True)
    xc = x - mean
    var = jnp.mean(xc * xc, axis=-1, keepdims=True)
    o_ref[...] = xc * jax.lax.rsqrt(var + eps) * g_ref[...] + b_ref[...]


def layernorm_pallas(x, gamma, beta, eps=1e-5):
    """LayerNorm over the last dim; x:(M,D) f32 -> (M,D) f32."""
    M, D = x.shape
    x = x.astype(jnp.float32)
    g2 = gamma.reshape(1, D).astype(jnp.float32)
    b2 = beta.reshape(1, D).astype(jnp.float32)
    tm = _pick_tile(M, 256)
    nm = M // tm

    kern = functools.partial(_layernorm_kernel, eps=eps)
    if nm == 1:
        return pl.pallas_call(
            kern, out_shape=jax.ShapeDtypeStruct((M, D), jnp.float32),
        )(x, g2, b2)

    return pl.pallas_call(
        kern,
        out_shape=jax.ShapeDtypeStruct((M, D), jnp.float32),
        grid=(nm,),
        in_specs=[
            pl.BlockSpec((tm, D), lambda i: (i, 0)),
            pl.BlockSpec((1, D), lambda i: (0, 0)),
            pl.BlockSpec((1, D), lambda i: (0, 0)),
        ],
        out_specs=pl.BlockSpec((tm, D), lambda i: (i, 0)),
        compiler_params=pltpu.CompilerParams(dimension_semantics=("parallel",)),
    )(x, g2, b2)


# --------------------------------------------------------------------------- attention kernel

def _mha_kernel(q_ref, k_ref, v_ref, o_ref, *, scale):
    q = (q_ref[...] * scale).astype(jnp.bfloat16)
    k = k_ref[...].astype(jnp.bfloat16)
    s = jnp.einsum("bqd,bkd->bqk", q, k, preferred_element_type=jnp.float32)
    s = s - jnp.max(s, axis=-1, keepdims=True)
    p = jnp.exp(s)
    p = p / jnp.sum(p, axis=-1, keepdims=True)
    o_ref[...] = jnp.einsum("bqk,bkd->bqd", p.astype(jnp.bfloat16),
                            v_ref[...].astype(jnp.bfloat16),
                            preferred_element_type=jnp.float32)


def mha_core_pallas(q, k, v, scale):
    """Softmax attention on (B*H, S, hd) tensors; whole problem fits one VMEM tile."""
    BH, S, hd = q.shape
    return pl.pallas_call(
        functools.partial(_mha_kernel, scale=scale),
        out_shape=jax.ShapeDtypeStruct((BH, S, hd), jnp.float32),
    )(q.astype(jnp.float32), k.astype(jnp.float32), v.astype(jnp.float32))


# --------------------------------------------------------------------------- pure-JAX reference ops

def _linear_ref(x, w, b=None, activation=None):
    out = jnp.dot(x.astype(jnp.bfloat16), w.astype(jnp.bfloat16),
                  preferred_element_type=jnp.float32)
    if b is not None:
        out = out + b
    if activation == "gelu":
        out = _gelu(out)
    return out


def _layernorm_ref(x, gamma, beta, eps=1e-5):
    mean = jnp.mean(x, axis=-1, keepdims=True)
    xc = x - mean
    var = jnp.mean(xc * xc, axis=-1, keepdims=True)
    return xc * jax.lax.rsqrt(var + eps) * gamma + beta


def _mha_ref(q, k, v, scale):
    qs = (q * scale).astype(jnp.bfloat16)
    s = jnp.einsum("bqd,bkd->bqk", qs, k.astype(jnp.bfloat16),
                   preferred_element_type=jnp.float32)
    s = s - jnp.max(s, axis=-1, keepdims=True)
    p = jnp.exp(s)
    p = p / jnp.sum(p, axis=-1, keepdims=True)
    return jnp.einsum("bqk,bkd->bqd", p.astype(jnp.bfloat16), v.astype(jnp.bfloat16),
                      preferred_element_type=jnp.float32)


# --------------------------------------------------------------------------- ViT forward (shared)

def _vit_forward(x, params, cfg, linear, layer_norm, mha_core,
                 output="cls", normalize=True):
    """Mirrors FrozenOpenCLIPImageEmbedder.forward(x, output)."""
    B, C, Hh, Ww = x.shape
    p = cfg["patch"]
    D = cfg["width"]
    H = cfg["heads"]
    hd = D // H
    gh, gw = Hh // p, Ww // p
    P = gh * gw
    S = P + 1

    # --- visual_tokenizer ---------------------------------------------------
    # conv1 with stride == kernel and no bias == patchify + matmul.
    patches = x.reshape(B, C, gh, p, gw, p).transpose(0, 2, 4, 1, 3, 5)
    patches = patches.reshape(B * P, C * p * p)
    tok = linear(patches, params["w_patch"]).reshape(B, P, D)

    cls_tok = jnp.broadcast_to(params["cls"].reshape(1, 1, D), (B, 1, D))
    xs = jnp.concatenate([cls_tok, tok], axis=1) + params["pos"][None]      # (B, S, D)
    # patch_dropout: identity in frozen/eval mode.
    xs = layer_norm(xs.reshape(B * S, D),
                    params["ln_pre_g"], params["ln_pre_b"]).reshape(B, S, D)

    # --- transformer resblocks (layer_idx == 0 -> run all blocks) ------------
    for blk in params["blocks"]:
        y = layer_norm(xs.reshape(B * S, D), blk["ln1_g"], blk["ln1_b"])
        qkv = linear(y, blk["w_qkv"], blk["b_qkv"]).reshape(B, S, 3, H, hd)
        q = qkv[:, :, 0].transpose(0, 2, 1, 3).reshape(B * H, S, hd)
        k = qkv[:, :, 1].transpose(0, 2, 1, 3).reshape(B * H, S, hd)
        v = qkv[:, :, 2].transpose(0, 2, 1, 3).reshape(B * H, S, hd)
        attn = mha_core(q, k, v, hd ** -0.5)
        attn = attn.reshape(B, H, S, hd).transpose(0, 2, 1, 3).reshape(B * S, D)
        xs = xs + linear(attn, blk["w_out"], blk["b_out"]).reshape(B, S, D)

        y = layer_norm(xs.reshape(B * S, D), blk["ln2_g"], blk["ln2_b"])
        y = linear(y, blk["w_fc"], blk["b_fc"], activation="gelu")
        y = linear(y, blk["w_proj"], blk["b_proj"])
        xs = xs + y.reshape(B, S, D)

    # --- post_process ---------------------------------------------------------
    if output == "full":
        outs = xs                   # all tokens
    elif output == "local":
        outs = xs[:, 1:]            # patch tokens
    else:                           # 'cls': pooled CLS token, unsqueezed
        outs = xs[:, :1]            # (B, 1, D)

    if normalize:
        Bo, So, _ = outs.shape
        y = layer_norm(outs.reshape(Bo * So, D),
                       params["ln_post_g"], params["ln_post_b"])
        y = linear(y, params["proj"])                    # (Bo*So, out_dim)
        outs = y.reshape(Bo, So, -1)
    return outs


# --------------------------------------------------------------------------- module wrapper

class FrozenOpenCLIPImageEmbedderPallas:
    """Frozen OpenCLIP ViT image embedder forward pass on Pallas TPU kernels.

    TODO(synk): preprocess()/encode() bicubic antialiased resize, scale_factor>1
    positional-embedding interpolation, tps_warp and pretrained OpenCLIP weight
    loading are outside the forward pass and not implemented here.
    """

    def __init__(self, params, cfg, normalize=True):
        self.params = params
        self.cfg = cfg
        self.normalize = normalize

        def fwd(x, p, output):
            return _vit_forward(x, p, cfg, linear_pallas, layernorm_pallas,
                                mha_core_pallas, output=output, normalize=normalize)

        self._fwd = jax.jit(fwd, static_argnames=("output",))

    def __call__(self, x, output="cls"):
        return self._fwd(x, self.params, output=output)


# --------------------------------------------------------------------------- parameter init

def init_params(key, cfg):
    C = 3
    p = cfg["patch"]
    D = cfg["width"]
    L = cfg["layers"]
    g = cfg["image_size"] // p
    S = g * g + 1

    keys = iter(jax.random.split(key, 8 + 12 * L))

    def normal(shape, scale):
        return jax.random.normal(next(keys), shape, jnp.float32) * scale

    def ln_pair():
        gamma = 1.0 + 0.05 * jax.random.normal(next(keys), (D,), jnp.float32)
        beta = 0.05 * jax.random.normal(next(keys), (D,), jnp.float32)
        return gamma, beta

    params = {
        "w_patch": normal((C * p * p, D), (C * p * p) ** -0.5),
        "cls": normal((D,), 0.02),
        "pos": normal((S, D), 0.02),
    }
    params["ln_pre_g"], params["ln_pre_b"] = ln_pair()
    params["ln_post_g"], params["ln_post_b"] = ln_pair()
    params["proj"] = normal((D, cfg["out_dim"]), D ** -0.5)

    blocks = []
    for _ in range(L):
        blk = {}
        blk["ln1_g"], blk["ln1_b"] = ln_pair()
        blk["w_qkv"] = normal((D, 3 * D), D ** -0.5)
        blk["b_qkv"] = normal((3 * D,), 0.02)
        blk["w_out"] = normal((D, D), D ** -0.5)
        blk["b_out"] = normal((D,), 0.02)
        blk["ln2_g"], blk["ln2_b"] = ln_pair()
        blk["w_fc"] = normal((D, 4 * D), D ** -0.5)
        blk["b_fc"] = normal((4 * D,), 0.02)
        blk["w_proj"] = normal((4 * D, D), (4 * D) ** -0.5)
        blk["b_proj"] = normal((D,), 0.02)
        blocks.append(blk)
    params["blocks"] = blocks
    return params


# --------------------------------------------------------------------------- demo / self-check

if __name__ == "__main__":
    cfg = dict(image_size=16, patch=8, width=128, heads=4, layers=2, out_dim=128)
    B = 2

    root = jax.random.PRNGKey(0)
    k_params, k_x = jax.random.split(root)
    params = init_params(k_params, cfg)
    x = jax.random.normal(k_x, (B, 3, cfg["image_size"], cfg["image_size"]), jnp.float32)

    embedder = FrozenOpenCLIPImageEmbedderPallas(params, cfg)
    out = embedder(x, output="cls")                    # (B, 1, out_dim)
    out = jax.block_until_ready(out)

    # Pure-JAX reference with identical math (same bf16 MXU operands, f32 accumulation).
    ref = _vit_forward(x, params, cfg, _linear_ref, _layernorm_ref, _mha_ref,
                       output="cls", normalize=True)
    ref = jax.block_until_ready(ref)

    assert out.shape == (B, 1, cfg["out_dim"]), out.shape
    err = float(jnp.max(jnp.abs(out - ref)))
    assert err < 2e-3, f"max abs err {err}"

    print("KERNEL_OK")
</pallas_src>

<mosaic_0001>
module attributes {stable_mosaic.version = 11 : i64} {
  func.func @_linear_kernel_nogrid(%arg0: memref<8x192xf32, #tpu.memory_space<vmem>>, %arg1: memref<192x128xf32, #tpu.memory_space<vmem>>, %arg2: memref<1x128xf32, #tpu.memory_space<vmem>>, %arg3: memref<8x128xf32, #tpu.memory_space<vmem>>) attributes {dimension_semantics = [], scalar_prefetch = 0 : i64, scratch_operands = 0 : i64, tpu.core_type = #tpu.core_type<tc>} {
    %c0 = arith.constant 0 : index
    %c0_0 = arith.constant 0 : index
    %0 = vector.load %arg0[%c0, %c0_0] : memref<8x192xf32, #tpu.memory_space<vmem>>, vector<8x192xf32>
    %1 = arith.truncf %0 : vector<8x192xf32> to vector<8x192xbf16>
    %c0_1 = arith.constant 0 : index
    %c0_2 = arith.constant 0 : index
    %2 = vector.load %arg1[%c0_1, %c0_2] : memref<192x128xf32, #tpu.memory_space<vmem>>, vector<192x128xf32>
    %3 = arith.truncf %2 : vector<192x128xf32> to vector<192x128xbf16>
    %cst = arith.constant dense<0.000000e+00> : vector<8x128xf32>
    %4 = tpu.matmul %1, %3, %cst {dimension_numbers = #tpu.dot_dimension_numbers<[1], [0], [0], [1], [0, 0, 1, 1], [], []>} : vector<8x192xbf16>, vector<192x128xbf16>, vector<8x128xf32> -> vector<8x128xf32>
    %c0_3 = arith.constant 0 : index
    %c0_4 = arith.constant 0 : index
    %5 = vector.load %arg2[%c0_3, %c0_4] : memref<1x128xf32, #tpu.memory_space<vmem>>, vector<1x128xf32>
    %6 = vector.broadcast %5 : vector<1x128xf32> to vector<8x128xf32>
    %7 = arith.addf %4, %6 : vector<8x128xf32>
    %c0_5 = arith.constant 0 : index
    %c0_6 = arith.constant 0 : index
    %8 = vector.load %arg3[%c0_5, %c0_6] : memref<8x128xf32, #tpu.memory_space<vmem>>, vector<8x128xf32>
    tpu.vector_store %arg3[%c0_5, %c0_6], %7 {strides = array<i32>} : memref<8x128xf32, #tpu.memory_space<vmem>>, vector<8x128xf32>,
    return
  }
}

module attributes {stable_mosaic.version = 11 : i64} {
  func.func @_linear_kernel_nogrid(%arg0: memref<10x128xf32, #tpu.memory_space<vmem>>, %arg1: memref<128x384xf32, #tpu.memory_space<vmem>>, %arg2: memref<1x384xf32, #tpu.memory_space<vmem>>, %arg3: memref<10x384xf32, #tpu.memory_space<vmem>>) attributes {dimension_semantics = [], scalar_prefetch = 0 : i64, scratch_operands = 0 : i64, tpu.core_type = #tpu.core_type<tc>} {
    %c0 = arith.constant 0 : index
    %c0_0 = arith.constant 0 : index
    %0 = vector.load %arg0[%c0, %c0_0] : memref<10x128xf32, #tpu.memory_space<vmem>>, vector<10x128xf32>
    %1 = arith.truncf %0 : vector<10x128xf32> to vector<10x128xbf16>
    %c0_1 = arith.constant 0 : index
    %c0_2 = arith.constant 0 : index
    %2 = vector.load %arg1[%c0_1, %c0_2] : memref<128x384xf32, #tpu.memory_space<vmem>>, vector<128x384xf32>
    %3 = arith.truncf %2 : vector<128x384xf32> to vector<128x384xbf16>
    %cst = arith.constant dense<0.000000e+00> : vector<10x384xf32>
    %4 = tpu.matmul %1, %3, %cst {dimension_numbers = #tpu.dot_dimension_numbers<[1], [0], [0], [1], [0, 0, 1, 1], [], []>} : vector<10x128xbf16>, vector<128x384xbf16>, vector<10x384xf32> -> vector<10x384xf32>
    %c0_3 = arith.constant 0 : index
    %c0_4 = arith.constant 0 : index
    %5 = vector.load %arg2[%c0_3, %c0_4] : memref<1x384xf32, #tpu.memory_space<vmem>>, vector<1x384xf32>
    %6 = vector.broadcast %5 : vector<1x384xf32> to vector<10x384xf32>
    %7 = arith.addf %4, %6 : vector<10x384xf32>
    %c0_5 = arith.constant 0 : index
    %c0_6 = arith.constant 0 : index
    %8 = vector.load %arg3[%c0_5, %c0_6] : memref<10x384xf32, #tpu.memory_space<vmem>>, vector<10x384xf32>
    tpu.vector_store %arg3[%c0_5, %c0_6], %7 {strides = array<i32>} : memref<10x384xf32, #tpu.memory_space<vmem>>, vector<10x384xf32>,
    return
  }
}

module attributes {stable_mosaic.version = 11 : i64} {
  func.func @_layernorm_kernel(%arg0: memref<10x128xf32, #tpu.memory_space<vmem>>, %arg1: memref<1x128xf32, #tpu.memory_space<vmem>>, %arg2: memref<1x128xf32, #tpu.memory_space<vmem>>, %arg3: memref<10x128xf32, #tpu.memory_space<vmem>>) attributes {dimension_semantics = [], scalar_prefetch = 0 : i64, scratch_operands = 0 : i64, tpu.core_type = #tpu.core_type<tc>} {
    %c0 = arith.constant 0 : index
    %c0_0 = arith.constant 0 : index
    %0 = vector.load %arg0[%c0, %c0_0] : memref<10x128xf32, #tpu.memory_space<vmem>>, vector<10x128xf32>
    %cst = arith.constant dense<0.000000e+00> : vector<10xf32>
    %1 = vector.multi_reduction <add>, %0, %cst [1] : vector<10x128xf32> to vector<10xf32>
    %2 = vector.shape_cast %1 : vector<10xf32> to vector<10x1xf32>
    %cst_1 = arith.constant 1.280000e+02 : f32
    %3 = vector.broadcast %cst_1 : f32 to vector<10x1xf32>
    %4 = arith.divf %2, %3 : vector<10x1xf32>
    %5 = vector.broadcast %4 : vector<10x1xf32> to vector<10x128xf32>
    %6 = arith.subf %0, %5 : vector<10x128xf32>
    %7 = arith.mulf %6, %6 : vector<10x128xf32>
    %cst_2 = arith.constant dense<0.000000e+00> : vector<10xf32>
    %8 = vector.multi_reduction <add>, %7, %cst_2 [1] : vector<10x128xf32> to vector<10xf32>
    %9 = vector.shape_cast %8 : vector<10xf32> to vector<10x1xf32>
    %cst_3 = arith.constant 1.280000e+02 : f32
    %10 = vector.broadcast %cst_3 : f32 to vector<10x1xf32>
    %11 = arith.divf %9, %10 : vector<10x1xf32>
    %cst_4 = arith.constant 9.99999974E-6 : f32
    %12 = vector.broadcast %cst_4 : f32 to vector<10x1xf32>
    %13 = arith.addf %11, %12 : vector<10x1xf32>
    %14 = math.rsqrt %13 : vector<10x1xf32>
    %15 = vector.broadcast %14 : vector<10x1xf32> to vector<10x128xf32>
    %16 = arith.mulf %6, %15 : vector<10x128xf32>
    %c0_5 = arith.constant 0 : index
    %c0_6 = arith.constant 0 : index
    %17 = vector.load %arg1[%c0_5, %c0_6] : memref<1x128xf32, #tpu.memory_space<vmem>>, vector<1x128xf32>
    %18 = vector.broadcast %17 : vector<1x128xf32> to vector<10x128xf32>
    %19 = arith.mulf %16, %18 : vector<10x128xf32>
    %c0_7 = arith.constant 0 : index
    %c0_8 = arith.constant 0 : index
    %20 = vector.load %arg2[%c0_7, %c0_8] : memref<1x128xf32, #tpu.memory_space<vmem>>, vector<1x128xf32>
    %21 = vector.broadcast %20 : vector<1x128xf32> to vector<10x128xf32>
    %22 = arith.addf %19, %21 : vector<10x128xf32>
    %c0_9 = arith.constant 0 : index
    %c0_10 = arith.constant 0 : index
    %23 = vector.load %arg3[%c0_9, %c0_10] : memref<10x128xf32, #tpu.memory_space<vmem>>, vector<10x128xf32>
    tpu.vector_store %arg3[%c0_9, %c0_10], %22 {strides = array<i32>} : memref<10x128xf32, #tpu.memory_space<vmem>>, vector<10x128xf32>,
    return
  }
}

module attributes {stable_mosaic.version = 11 : i64} {
  func.func @_mha_kernel(%arg0: memref<8x5x32xf32, #tpu.memory_space<vmem>>, %arg1: memref<8x5x32xf32, #tpu.memory_space<vmem>>, %arg2: memref<8x5x32xf32, #tpu.memory_space<vmem>>, %arg3: memref<8x5x32xf32, #tpu.memory_space<vmem>>) attributes {dimension_semantics = [], scalar_prefetch = 0 : i64, scratch_operands = 0 : i64, tpu.core_type = #tpu.core_type<tc>} {
    %c0 = arith.constant 0 : index
    %c0_0 = arith.constant 0 : index
    %c0_1 = arith.constant 0 : index
    %0 = vector.load %arg0[%c0, %c0_0, %c0_1] : memref<8x5x32xf32, #tpu.memory_space<vmem>>, vector<8x5x32xf32>
    %cst = arith.constant 0.176776692 : f32
    %1 = vector.broadcast %cst : f32 to vector<8x5x32xf32>
    %2 = arith.mulf %0, %1 : vector<8x5x32xf32>
    %3 = arith.truncf %2 : vector<8x5x32xf32> to vector<8x5x32xbf16>
    %c0_2 = arith.constant 0 : index
    %c0_3 = arith.constant 0 : index
    %c0_4 = arith.constant 0 : index
    %4 = vector.load %arg1[%c0_2, %c0_3, %c0_4] : memref<8x5x32xf32, #tpu.memory_space<vmem>>, vector<8x5x32xf32>
    %5 = arith.truncf %4 : vector<8x5x32xf32> to vector<8x5x32xbf16>
    "tpu.trace_start"() <{level = 10 : i32, message = "bqd,bkd->bqk"}> : () -> ()
    %cst_5 = arith.constant dense<0.000000e+00> : vector<8x5x5xf32>
    %6 = tpu.matmul %3, %5, %cst_5 {dimension_numbers = #tpu.dot_dimension_numbers<[2], [2], [1], [1], [0, 0, 0, 1, 1, 1], [0], [0]>} : vector<8x5x32xbf16>, vector<8x5x32xbf16>, vector<8x5x5xf32> -> vector<8x5x5xf32>
    "tpu.trace_stop"() : () -> ()
    %cst_6 = arith.constant dense<0xFF800000> : vector<8x5xf32>
    %7 = vector.multi_reduction <maximumf>, %6, %cst_6 [2] : vector<8x5x5xf32> to vector<8x5xf32>
    %8 = vector.shape_cast %7 : vector<8x5xf32> to vector<8x5x1xf32>
    %9 = vector.broadcast %8 : vector<8x5x1xf32> to vector<8x5x5xf32>
    %10 = arith.subf %6, %9 : vector<8x5x5xf32>
    %11 = math.exp %10 : vector<8x5x5xf32>
    %cst_7 = arith.constant dense<0.000000e+00> : vector<8x5xf32>
    %12 = vector.multi_reduction <add>, %11, %cst_7 [2] : vector<8x5x5xf32> to vector<8x5xf32>
    %13 = vector.shape_cast %12 : vector<8x5xf32> to vector<8x5x1xf32>
    %14 = vector.broadcast %13 : vector<8x5x1xf32> to vector<8x5x5xf32>
    %15 = arith.divf %11, %14 : vector<8x5x5xf32>
    %16 = arith.truncf %15 : vector<8x5x5xf32> to vector<8x5x5xbf16>
    %c0_8 = arith.constant 0 : index
    %c0_9 = arith.constant 0 : index
    %c0_10 = arith.constant 0 : index
    %17 = vector.load %arg2[%c0_8, %c0_9, %c0_10] : memref<8x5x32xf32, #tpu.memory_space<vmem>>, vector<8x5x32xf32>
    %18 = arith.truncf %17 : vector<8x5x32xf32> to vector<8x5x32xbf16>
    "tpu.trace_start"() <{level = 10 : i32, message = "bqk,bkd->bqd"}> : () -> ()
    %cst_11 = arith.constant dense<0.000000e+00> : vector<8x5x32xf32>
    %19 = tpu.matmul %16, %18, %cst_11 {dimension_numbers = #tpu.dot_dimension_numbers<[2], [1], [1], [2], [0, 0, 0, 1, 1, 2], [0], [0]>} : vector<8x5x5xbf16>, vector<8x5x32xbf16>, vector<8x5x32xf32> -> vector<8x5x32xf32>
    "tpu.trace_stop"() : () -> ()
    %c0_12 = arith.constant 0 : index
    %c0_13 = arith.constant 0 : index
    %c0_14 = arith.constant 0 : index
    %20 = vector.load %arg3[%c0_12, %c0_13, %c0_14] : memref<8x5x32xf32, #tpu.memory_space<vmem>>, vector<8x5x32xf32>
    tpu.vector_store %arg3[%c0_12, %c0_13, %c0_14], %19 {strides = array<i32>} : memref<8x5x32xf32, #tpu.memory_space<vmem>>, vector<8x5x32xf32>,
    return
  }
}

module attributes {stable_mosaic.version = 11 : i64} {
  func.func @_linear_kernel_nogrid(%arg0: memref<10x128xf32, #tpu.memory_space<vmem>>, %arg1: memref<128x128xf32, #tpu.memory_space<vmem>>, %arg2: memref<1x128xf32, #tpu.memory_space<vmem>>, %arg3: memref<10x128xf32, #tpu.memory_space<vmem>>) attributes {dimension_semantics = [], scalar_prefetch = 0 : i64, scratch_operands = 0 : i64, tpu.core_type = #tpu.core_type<tc>} {
    %c0 = arith.constant 0 : index
    %c0_0 = arith.constant 0 : index
    %0 = vector.load %arg0[%c0, %c0_0] : memref<10x128xf32, #tpu.memory_space<vmem>>, vector<10x128xf32>
    %1 = arith.truncf %0 : vector<10x128xf32> to vector<10x128xbf16>
    %c0_1 = arith.constant 0 : index
    %c0_2 = arith.constant 0 : index
    %2 = vector.load %arg1[%c0_1, %c0_2] : memref<128x128xf32, #tpu.memory_space<vmem>>, vector<128x128xf32>
    %3 = arith.truncf %2 : vector<128x128xf32> to vector<128x128xbf16>
    %cst = arith.constant dense<0.000000e+00> : vector<10x128xf32>
    %4 = tpu.matmul %1, %3, %cst {dimension_numbers = #tpu.dot_dimension_numbers<[1], [0], [0], [1], [0, 0, 1, 1], [], []>} : vector<10x128xbf16>, vector<128x128xbf16>, vector<10x128xf32> -> vector<10x128xf32>
    %c0_3 = arith.constant 0 : index
    %c0_4 = arith.constant 0 : index
    %5 = vector.load %arg2[%c0_3, %c0_4] : memref<1x128xf32, #tpu.memory_space<vmem>>, vector<1x128xf32>
    %6 = vector.broadcast %5 : vector<1x128xf32> to vector<10x128xf32>
    %7 = arith.addf %4, %6 : vector<10x128xf32>
    %c0_5 = arith.constant 0 : index
    %c0_6 = arith.constant 0 : index
    %8 = vector.load %arg3[%c0_5, %c0_6] : memref<10x128xf32, #tpu.memory_space<vmem>>, vector<10x128xf32>
    tpu.vector_store %arg3[%c0_5, %c0_6], %7 {strides = array<i32>} : memref<10x128xf32, #tpu.memory_space<vmem>>, vector<10x128xf32>,
    return
  }
}

module attributes {stable_mosaic.version = 11 : i64} {
  func.func @_linear_kernel_grid(%arg0: i32, %arg1: i32, %arg2: i32, %arg3: memref<10x256xf32, #tpu.memory_space<vmem>>, %arg4: memref<256x128xf32, #tpu.memory_space<vmem>>, %arg5: memref<1x128xf32, #tpu.memory_space<vmem>>, %arg6: memref<10x128xf32, #tpu.memory_space<vmem>>, %arg7: memref<10x128xf32, #tpu.memory_space<vmem>>) attributes {dimension_semantics = [#tpu.dimension_semantics<parallel>, #tpu.dimension_semantics<parallel>, #tpu.dimension_semantics<arbitrary>], iteration_bounds = array<i64: 1, 1, 2>, scalar_prefetch = 0 : i64, scratch_operands = 1 : i64, tpu.core_type = #tpu.core_type<tc>, window_params = [{transform_indices = @transform_0, window_bounds = array<i64: 10, 256>}, {transform_indices = @transform_1, window_bounds = array<i64: 256, 128>}, {transform_indices = @transform_2, window_bounds = array<i64: 1, 128>}, {transform_indices = @transform_3, window_bounds = array<i64: 10, 128>}]} {
    %c0_i32 = arith.constant 0 : i32
    %0 = arith.cmpi eq, %arg2, %c0_i32 : i32
    %1 = arith.extui %0 : i1 to i32
    %c0_i32_0 = arith.constant 0 : i32
    %2 = arith.cmpi ne, %1, %c0_i32_0 : i32
    scf.if %2 {
      %cst_9 = arith.constant 0.000000e+00 : f32
      %14 = vector.broadcast %cst_9 : f32 to vector<10x128xf32>
      %c0_10 = arith.constant 0 : index
      %c0_11 = arith.constant 0 : index
      %15 = vector.load %arg7[%c0_10, %c0_11] : memref<10x128xf32, #tpu.memory_space<vmem>>, vector<10x128xf32>
      tpu.vector_store %arg7[%c0_10, %c0_11], %14 {strides = array<i32>} : memref<10x128xf32, #tpu.memory_space<vmem>>, vector<10x128xf32>,
    } else {
    }
    %c0 = arith.constant 0 : index
    %c0_1 = arith.constant 0 : index
    %3 = vector.load %arg7[%c0, %c0_1] : memref<10x128xf32, #tpu.memory_space<vmem>>, vector<10x128xf32>
    %c0_2 = arith.constant 0 : index
    %c0_3 = arith.constant 0 : index
    %4 = vector.load %arg3[%c0_2, %c0_3] : memref<10x256xf32, #tpu.memory_space<vmem>>, vector<10x256xf32>
    %5 = arith.truncf %4 : vector<10x256xf32> to vector<10x256xbf16>
    %c0_4 = arith.constant 0 : index
    %c0_5 = arith.constant 0 : index
    %6 = vector.load %arg4[%c0_4, %c0_5] : memref<256x128xf32, #tpu.memory_space<vmem>>, vector<256x128xf32>
    %7 = arith.truncf %6 : vector<256x128xf32> to vector<256x128xbf16>
    %cst = arith.constant dense<0.000000e+00> : vector<10x128xf32>
    %8 = tpu.matmul %5, %7, %cst {dimension_numbers = #tpu.dot_dimension_numbers<[1], [0], [0], [1], [0, 0, 1, 1], [], []>} : vector<10x256xbf16>, vector<256x128xbf16>, vector<10x128xf32> -> vector<10x128xf32>
    %9 = arith.addf %3, %8 : vector<10x128xf32>
    %c0_6 = arith.constant 0 : index
    %c0_7 = arith.constant 0 : index
    %10 = vector.load %arg7[%c0_6, %c0_7] : memref<10x128xf32, #tpu.memory_space<vmem>>, vector<10x128xf32>
    tpu.vector_store %arg7[%c0_6, %c0_7], %9 {strides = array<i32>} : memref<10x128xf32, #tpu.memory_space<vmem>>, vector<10x128xf32>,
    %c1_i32 = arith.constant 1 : i32
    %11 = arith.cmpi eq, %arg2, %c1_i32 : i32
    %12 = arith.extui %11 : i1 to i32
    %c0_i32_8 = arith.constant 0 : i32
    %13 = arith.cmpi ne, %12, %c0_i32_8 : i32
    scf.if %13 {
      %c0_9 = arith.constant 0 : index
      %c0_10 = arith.constant 0 : index
      %14 = vector.load %arg7[%c0_9, %c0_10] : memref<10x128xf32, #tpu.memory_space<vmem>>, vector<10x128xf32>
      %c0_11 = arith.constant 0 : index
      %c0_12 = arith.constant 0 : index
      %15 = vector.load %arg5[%c0_11, %c0_12] : memref<1x128xf32, #tpu.memory_space<vmem>>, vector<1x128xf32>
      %16 = vector.broadcast %15 : vector<1x128xf32> to vector<10x128xf32>
      %17 = arith.addf %14, %16 : vector<10x128xf32>
      %c0_13 = arith.constant 0 : index
      %c0_14 = arith.constant 0 : index
      %18 = vector.load %arg6[%c0_13, %c0_14] : memref<10x128xf32, #tpu.memory_space<vmem>>, vector<10x128xf32>
      tpu.vector_store %arg6[%c0_13, %c0_14], %17 {strides = array<i32>} : memref<10x128xf32, #tpu.memory_space<vmem>>, vector<10x128xf32>,
    } else {
    }
    return
  }
  func.func @transform_0(%arg0: i32, %arg1: i32, %arg2: i32) -> (i32, i32) {
    %c0_i32 = arith.constant 0 : i32
    return %arg0, %arg2 : i32, i32
  }
  func.func @transform_1(%arg0: i32, %arg1: i32, %arg2: i32) -> (i32, i32) {
    %c0_i32 = arith.constant 0 : i32
    return %arg2, %arg1 : i32, i32
  }
  func.func @transform_2(%arg0: i32, %arg1: i32, %arg2: i32) -> (i32, i32) {
    %c0_i32 = arith.constant 0 : i32
    %c0_i32_0 = arith.constant 0 : i32
    return %c0_i32, %arg1 : i32, i32
  }
  func.func @transform_3(%arg0: i32, %arg1: i32, %arg2: i32) -> (i32, i32) {
    %c0_i32 = arith.constant 0 : i32
    return %arg0, %arg1 : i32, i32
  }
}

module attributes {stable_mosaic.version = 11 : i64} {
  func.func @_linear_kernel_grid(%arg0: i32, %arg1: i32, %arg2: i32, %arg3: memref<10x128xf32, #tpu.memory_space<vmem>>, %arg4: memref<128x256xf32, #tpu.memory_space<vmem>>, %arg5: memref<1x256xf32, #tpu.memory_space<vmem>>, %arg6: memref<10x256xf32, #tpu.memory_space<vmem>>, %arg7: memref<10x256xf32, #tpu.memory_space<vmem>>) attributes {dimension_semantics = [#tpu.dimension_semantics<parallel>, #tpu.dimension_semantics<parallel>, #tpu.dimension_semantics<arbitrary>], iteration_bounds = array<i64: 1, 2, 1>, scalar_prefetch = 0 : i64, scratch_operands = 1 : i64, tpu.core_type = #tpu.core_type<tc>, window_params = [{transform_indices = @transform_0, window_bounds = array<i64: 10, 128>}, {transform_indices = @transform_1, window_bounds = array<i64: 128, 256>}, {transform_indices = @transform_2, window_bounds = array<i64: 1, 256>}, {transform_indices = @transform_3, window_bounds = array<i64: 10, 256>}]} {
    %c0_i32 = arith.constant 0 : i32
    %0 = arith.cmpi eq, %arg2, %c0_i32 : i32
    %1 = arith.extui %0 : i1 to i32
    %c0_i32_0 = arith.constant 0 : i32
    %2 = arith.cmpi ne, %1, %c0_i32_0 : i32
    scf.if %2 {
      %cst_10 = arith.constant 0.000000e+00 : f32
      %14 = vector.broadcast %cst_10 : f32 to vector<10x256xf32>
      %c0_11 = arith.constant 0 : index
      %c0_12 = arith.constant 0 : index
      %15 = vector.load %arg7[%c0_11, %c0_12] : memref<10x256xf32, #tpu.memory_space<vmem>>, vector<10x256xf32>
      tpu.vector_store %arg7[%c0_11, %c0_12], %14 {strides = array<i32>} : memref<10x256xf32, #tpu.memory_space<vmem>>, vector<10x256xf32>,
    } else {
    }
    %c0 = arith.constant 0 : index
    %c0_1 = arith.constant 0 : index
    %3 = vector.load %arg7[%c0, %c0_1] : memref<10x256xf32, #tpu.memory_space<vmem>>, vector<10x256xf32>
    %c0_2 = arith.constant 0 : index
    %c0_3 = arith.constant 0 : index
    %4 = vector.load %arg3[%c0_2, %c0_3] : memref<10x128xf32, #tpu.memory_space<vmem>>, vector<10x128xf32>
    %5 = arith.truncf %4 : vector<10x128xf32> to vector<10x128xbf16>
    %c0_4 = arith.constant 0 : index
    %c0_5 = arith.constant 0 : index
    %6 = vector.load %arg4[%c0_4, %c0_5] : memref<128x256xf32, #tpu.memory_space<vmem>>, vector<128x256xf32>
    %7 = arith.truncf %6 : vector<128x256xf32> to vector<128x256xbf16>
    %cst = arith.constant dense<0.000000e+00> : vector<10x256xf32>
    %8 = tpu.matmul %5, %7, %cst {dimension_numbers = #tpu.dot_dimension_numbers<[1], [0], [0], [1], [0, 0, 1, 1], [], []>} : vector<10x128xbf16>, vector<128x256xbf16>, vector<10x256xf32> -> vector<10x256xf32>
    %9 = arith.addf %3, %8 : vector<10x256xf32>
    %c0_6 = arith.constant 0 : index
    %c0_7 = arith.constant 0 : index
    %10 = vector.load %arg7[%c0_6, %c0_7] : memref<10x256xf32, #tpu.memory_space<vmem>>, vector<10x256xf32>
    tpu.vector_store %arg7[%c0_6, %c0_7], %9 {strides = array<i32>} : memref<10x256xf32, #tpu.memory_space<vmem>>, vector<10x256xf32>,
    %c0_i32_8 = arith.constant 0 : i32
    %11 = arith.cmpi eq, %arg2, %c0_i32_8 : i32
    %12 = arith.extui %11 : i1 to i32
    %c0_i32_9 = arith.constant 0 : i32
    %13 = arith.cmpi ne, %12, %c0_i32_9 : i32
    scf.if %13 {
      %c0_10 = arith.constant 0 : index
      %c0_11 = arith.constant 0 : index
      %14 = vector.load %arg7[%c0_10, %c0_11] : memref<10x256xf32, #tpu.memory_space<vmem>>, vector<10x256xf32>
      %c0_12 = arith.constant 0 : index
      %c0_13 = arith.constant 0 : index
      %15 = vector.load %arg5[%c0_12, %c0_13] : memref<1x256xf32, #tpu.memory_space<vmem>>, vector<1x256xf32>
      %16 = vector.broadcast %15 : vector<1x256xf32> to vector<10x256xf32>
      %17 = arith.addf %14, %16 : vector<10x256xf32>
      %cst_14 = arith.constant 5.000000e-01 : f32
      %18 = vector.broadcast %cst_14 : f32 to vector<10x256xf32>
      %19 = arith.mulf %18, %17 : vector<10x256xf32>
      %cst_15 = arith.constant 4.471500e-02 : f32
      %20 = vector.broadcast %cst_15 : f32 to vector<10x256xf32>
      %21 = arith.mulf %20, %17 : vector<10x256xf32>
      %22 = arith.mulf %21, %17 : vector<10x256xf32>
      %23 = arith.mulf %22, %17 : vector<10x256xf32>
      %24 = arith.addf %17, %23 : vector<10x256xf32>
      %cst_16 = arith.constant 0.797884583 : f32
      %25 = vector.broadcast %cst_16 : f32 to vector<10x256xf32>
      %26 = arith.mulf %25, %24 : vector<10x256xf32>
      %27 = math.tanh %26 : vector<10x256xf32>
      %cst_17 = arith.constant 1.000000e+00 : f32
      %28 = vector.broadcast %cst_17 : f32 to vector<10x256xf32>
      %29 = arith.addf %28, %27 : vector<10x256xf32>
      %30 = arith.mulf %19, %29 : vector<10x256xf32>
      %c0_18 = arith.constant 0 : index
      %c0_19 = arith.constant 0 : index
      %31 = vector.load %arg6[%c0_18, %c0_19] : memref<10x256xf32, #tpu.memory_space<vmem>>, vector<10x256xf32>
      tpu.vector_store %arg6[%c0_18, %c0_19], %30 {strides = array<i32>} : memref<10x256xf32, #tpu.memory_space<vmem>>, vector<10x256xf32>,
    } else {
    }
    return
  }
  func.func @transform_0(%arg0: i32, %arg1: i32, %arg2: i32) -> (i32, i32) {
    %c0_i32 = arith.constant 0 : i32
    return %arg0, %arg2 : i32, i32
  }
  func.func @transform_1(%arg0: i32, %arg1: i32, %arg2: i32) -> (i32, i32) {
    %c0_i32 = arith.constant 0 : i32
    return %arg2, %arg1 : i32, i32
  }
  func.func @transform_2(%arg0: i32, %arg1: i32, %arg2: i32) -> (i32, i32) {
    %c0_i32 = arith.constant 0 : i32
    %c0_i32_0 = arith.constant 0 : i32
    return %c0_i32, %arg1 : i32, i32
  }
  func.func @transform_3(%arg0: i32, %arg1: i32, %arg2: i32) -> (i32, i32) {
    %c0_i32 = arith.constant 0 : i32
    return %arg0, %arg1 : i32, i32
  }
}

module attributes {stable_mosaic.version = 11 : i64} {
  func.func @_linear_kernel_nogrid(%arg0: memref<2x128xf32, #tpu.memory_space<vmem>>, %arg1: memref<128x128xf32, #tpu.memory_space<vmem>>, %arg2: memref<1x128xf32, #tpu.memory_space<vmem>>, %arg3: memref<2x128xf32, #tpu.memory_space<vmem>>) attributes {dimension_semantics = [], scalar_prefetch = 0 : i64, scratch_operands = 0 : i64, tpu.core_type = #tpu.core_type<tc>} {
    %c0 = arith.constant 0 : index
    %c0_0 = arith.constant 0 : index
    %0 = vector.load %arg0[%c0, %c0_0] : memref<2x128xf32, #tpu.memory_space<vmem>>, vector<2x128xf32>
    %1 = arith.truncf %0 : vector<2x128xf32> to vector<2x128xbf16>
    %c0_1 = arith.constant 0 : index
    %c0_2 = arith.constant 0 : index
    %2 = vector.load %arg1[%c0_1, %c0_2] : memref<128x128xf32, #tpu.memory_space<vmem>>, vector<128x128xf32>
    %3 = arith.truncf %2 : vector<128x128xf32> to vector<128x128xbf16>
    %cst = arith.constant dense<0.000000e+00> : vector<2x128xf32>
    %4 = tpu.matmul %1, %3, %cst {dimension_numbers = #tpu.dot_dimension_numbers<[1], [0], [0], [1], [0, 0, 1, 1], [], []>} : vector<2x128xbf16>, vector<128x128xbf16>, vector<2x128xf32> -> vector<2x128xf32>
    %c0_3 = arith.constant 0 : index
    %c0_4 = arith.constant 0 : index
    %5 = vector.load %arg2[%c0_3, %c0_4] : memref<1x128xf32, #tpu.memory_space<vmem>>, vector<1x128xf32>
    %6 = vector.broadcast %5 : vector<1x128xf32> to vector<2x128xf32>
    %7 = arith.addf %4, %6 : vector<2x128xf32>
    %c0_5 = arith.constant 0 : index
    %c0_6 = arith.constant 0 : index
    %8 = vector.load %arg3[%c0_5, %c0_6] : memref<2x128xf32, #tpu.memory_space<vmem>>, vector<2x128xf32>
    tpu.vector_store %arg3[%c0_5, %c0_6], %7 {strides = array<i32>} : memref<2x128xf32, #tpu.memory_space<vmem>>, vector<2x128xf32>,
    return
  }
}

module attributes {stable_mosaic.version = 11 : i64} {
  func.func @_layernorm_kernel(%arg0: memref<2x128xf32, #tpu.memory_space<vmem>>, %arg1: memref<1x128xf32, #tpu.memory_space<vmem>>, %arg2: memref<1x128xf32, #tpu.memory_space<vmem>>, %arg3: memref<2x128xf32, #tpu.memory_space<vmem>>) attributes {dimension_semantics = [], scalar_prefetch = 0 : i64, scratch_operands = 0 : i64, tpu.core_type = #tpu.core_type<tc>} {
    %c0 = arith.constant 0 : index
    %c0_0 = arith.constant 0 : index
    %0 = vector.load %arg0[%c0, %c0_0] : memref<2x128xf32, #tpu.memory_space<vmem>>, vector<2x128xf32>
    %cst = arith.constant dense<0.000000e+00> : vector<2xf32>
    %1 = vector.multi_reduction <add>, %0, %cst [1] : vector<2x128xf32> to vector<2xf32>
    %2 = vector.shape_cast %1 : vector<2xf32> to vector<2x1xf32>
    %cst_1 = arith.constant 1.280000e+02 : f32
    %3 = vector.broadcast %cst_1 : f32 to vector<2x1xf32>
    %4 = arith.divf %2, %3 : vector<2x1xf32>
    %5 = vector.broadcast %4 : vector<2x1xf32> to vector<2x128xf32>
    %6 = arith.subf %0, %5 : vector<2x128xf32>
    %7 = arith.mulf %6, %6 : vector<2x128xf32>
    %cst_2 = arith.constant dense<0.000000e+00> : vector<2xf32>
    %8 = vector.multi_reduction <add>, %7, %cst_2 [1] : vector<2x128xf32> to vector<2xf32>
    %9 = vector.shape_cast %8 : vector<2xf32> to vector<2x1xf32>
    %cst_3 = arith.constant 1.280000e+02 : f32
    %10 = vector.broadcast %cst_3 : f32 to vector<2x1xf32>
    %11 = arith.divf %9, %10 : vector<2x1xf32>
    %cst_4 = arith.constant 9.99999974E-6 : f32
    %12 = vector.broadcast %cst_4 : f32 to vector<2x1xf32>
    %13 = arith.addf %11, %12 : vector<2x1xf32>
    %14 = math.rsqrt %13 : vector<2x1xf32>
    %15 = vector.broadcast %14 : vector<2x1xf32> to vector<2x128xf32>
    %16 = arith.mulf %6, %15 : vector<2x128xf32>
    %c0_5 = arith.constant 0 : index
    %c0_6 = arith.constant 0 : index
    %17 = vector.load %arg1[%c0_5, %c0_6] : memref<1x128xf32, #tpu.memory_space<vmem>>, vector<1x128xf32>
    %18 = vector.broadcast %17 : vector<1x128xf32> to vector<2x128xf32>
    %19 = arith.mulf %16, %18 : vector<2x128xf32>
    %c0_7 = arith.constant 0 : index
    %c0_8 = arith.constant 0 : index
    %20 = vector.load %arg2[%c0_7, %c0_8] : memref<1x128xf32, #tpu.memory_space<vmem>>, vector<1x128xf32>
    %21 = vector.broadcast %20 : vector<1x128xf32> to vector<2x128xf32>
    %22 = arith.addf %19, %21 : vector<2x128xf32>
    %c0_9 = arith.constant 0 : index
    %c0_10 = arith.constant 0 : index
    %23 = vector.load %arg3[%c0_9, %c0_10] : memref<2x128xf32, #tpu.memory_space<vmem>>, vector<2x128xf32>
    tpu.vector_store %arg3[%c0_9, %c0_10], %22 {strides = array<i32>} : memref<2x128xf32, #tpu.memory_space<vmem>>, vector<2x128xf32>,
    return
  }
}

</mosaic_0001>

<bundles_post_ra>
// kernel: fwd.18
= control target key start
LH: loop header
LB: loop body
LE: loop exit
PB: predicated region body
PF: predicated region fallthrough
CT: control target
= control target key end

     0   :  { %v114_v0 = vmov 0   ;;  %vm62_vm0 = vcmask 523264   ;;  %s231_s1 = inlined_call_operand.vmem [shape: f32[192,128], index: 1, kind: input, shape index: {}]   ;;  %s232_s0 = inlined_call_operand.vmem [shape: f32[8,192], index: 0, kind: input, shape index: {}]   ;;  %s233_s2 = inlined_call_operand.vmem [shape: f32[1,128], index: 2, kind: input, shape index: {}]   ;;  %s234_s3 = inlined_call_operand.vmem [shape: f32[8,128], index: 3, kind: output, shape index: {}]  }
   0x1   :  { %66 = vmatprep.subr.bf16.mxu0 %v114_v0  ;;  %v19_v1 = vld [vmem:[%s231_s1] sm:$0xff]  ;;  %v20_v2 = vld [vmem:[%s231_s1 + $0x8] sm:$0xff]  ;;  %v21_v3 = vld [vmem:[%s231_s1 + $0x10] sm:$0xff] }
   0x2   :  { %v43_v4 = vpack.c.bf16 %v20_v2, %v19_v1  ;;  %v22_v5 = vld [vmem:[%s231_s1 + $0x18] sm:$0xff]  ;;  %v23_v7 = vld [vmem:[%s231_s1 + $0x20] sm:$0xff]  ;;  %v24_v8 = vld [vmem:[%s231_s1 + $0x28] sm:$0xff] }
   0x3   :  { %v44_v6 = vpack.c.bf16 %v22_v5, %v21_v3  ;;  %v45_v9 = vpack.c.bf16 %v24_v8, %v23_v7  ;;  %v25_v10 = vld [vmem:[%s231_s1 + $0x30] sm:$0xff]  ;;  %v26_v11 = vld [vmem:[%s231_s1 + $0x38] sm:$0xff]  ;;  %v16_v12 = vld [vmem:[%s232_s0 + $0x8] sm:$0xff] }
   0x4   :  { %67 = vmatpush1.bf16.msra.mxu0 %v43_v4  ;;  %v18_v13 = vpack.c.bf16 %v16_v12, %v16_v12  ;;  %v46_v14 = vpack.c.bf16 %v26_v11, %v25_v10  ;;  %v27_v15 = vld [vmem:[%s231_s1 + $0x40] sm:$0xff]  ;;  %v28_v16 = vld [vmem:[%s231_s1 + $0x48] sm:$0xff]  ;;  %v29_v18 = vld [vmem:[%s231_s1 + $0x50] sm:$0xff] }
   0x5   :  { %68 = vmatprep.subr.bf16.mxu0 %v114_v0  ;;  %v47_v17 = vpack.c.bf16 %v28_v16, %v27_v15  ;;  %v30_v19 = vld [vmem:[%s231_s1 + $0x58] sm:$0xff]  ;;  %v31_v21 = vld [vmem:[%s231_s1 + $0x60] sm:$0xff]  ;;  %v32_v22 = vld [vmem:[%s231_s1 + $0x68] sm:$0xff] }
   0x6   :  { %112 = vmatprep.mubr.msk.bf16.mxu0 %vm62_vm0, %v18_v13  ;;  %v48_v20 = vpack.c.bf16 %v30_v19, %v29_v18  ;;  %v49_v23 = vpack.c.bf16 %v32_v22, %v31_v21  ;;  %v33_v24 = vld [vmem:[%s231_s1 + $0x70] sm:$0xff]  ;;  %v34_v25 = vld [vmem:[%s231_s1 + $0x78] sm:$0xff]  ;;  %v35_v27 = vld [vmem:[%s231_s1 + $0x80] sm:$0xff] }
   0x7   :  { %v50_v26 = vpack.c.bf16 %v34_v25, %v33_v24  ;;  %v36_v28 = vld [vmem:[%s231_s1 + $0x88] sm:$0xff]  ;;  %v37_v30 = vld [vmem:[%s231_s1 + $0x90] sm:$0xff]  ;;  %v38_v31 = vld [vmem:[%s231_s1 + $0x98] sm:$0xff] }
   0x8   :  { %69 = vmatpush1.bf16.msra.mxu0 %v44_v6  ;;  %v51_v29 = vpack.c.bf16 %v36_v28, %v35_v27  ;;  %v52_v32 = vpack.c.bf16 %v38_v31, %v37_v30  ;;  %v39_v33 = vld [vmem:[%s231_s1 + $0xa0] sm:$0xff]  ;;  %v40_v34 = vld [vmem:[%s231_s1 + $0xa8] sm:$0xff]  ;;  %v41_v36 = vld [vmem:[%s231_s1 + $0xb0] sm:$0xff] }
   0x9   :  { %70 = vmatprep.subr.bf16.mxu0 %v114_v0  ;;  %v53_v35 = vpack.c.bf16 %v40_v34, %v39_v33  ;;  %v42_v37 = vld [vmem:[%s231_s1 + $0xb8] sm:$0xff]  ;;  %v15_v39 = vld [vmem:[%s232_s0] sm:$0xff] }
   0xa   :  { %v54_v38 = vpack.c.bf16 %v42_v37, %v41_v36  ;;  %v17_v40 = vpack.c.bf16 %v15_v39, %v15_v39  ;;  %v111_v41 = vld [vmem:[%s233_s2] ss:$0 sm:$0xff] }
   0xc   :  { %71 = vmatpush1.bf16.msra.mxu0 %v45_v9 }
   0xd   :  { %72 = vmatprep.subr.bf16.mxu0 %v114_v0 }
  0x10   :  { %73 = vmatpush1.bf16.msra.mxu0 %v46_v14 }
  0x11   :  { %74 = vmatprep.subr.bf16.mxu0 %v114_v0 }
  0x14   :  { %75 = vmatpush1.bf16.msra.mxu0 %v47_v17 }
  0x15   :  { %76 = vmatprep.subr.bf16.mxu0 %v114_v0 }
  0x18   :  { %77 = vmatpush1.bf16.msra.mxu0 %v48_v20 }
  0x19   :  { %78 = vmatprep.subr.bf16.mxu0 %v114_v0 }
  0x1c   :  { %79 = vmatpush1.bf16.msra.mxu0 %v49_v23 }
  0x1d   :  { %80 = vmatprep.subr.bf16.mxu0 %v114_v0 }
  0x20   :  { %81 = vmatpush1.bf16.msra.mxu0 %v50_v26 }
  0x21   :  { %82 = vmatprep.subr.bf16.mxu0 %v114_v0 }
  0x24   :  { %83 = vmatpush1.bf16.msra.mxu0 %v51_v29 }
  0x25   :  { %84 = vmatprep.subr.bf16.mxu0 %v114_v0 }
  0x28   :  { %85 = vmatpush1.bf16.msra.mxu0 %v52_v32 }
  0x29   :  { %86 = vmatprep.subr.bf16.mxu0 %v114_v0 }
  0x2c   :  { %87 = vmatpush1.bf16.msra.mxu0 %v53_v35 }
  0x2d   :  { %88 = vmatprep.subr.bf16.mxu0 %v114_v0 }
  0x30   :  { %89 = vmatpush1.bf16.msra.mxu0 %v54_v38 }
  0x33   :  { %99 = vmatmul.mubr.bf16.vlgmr.msra.gmra.mrb[0].mxu0 %v17_v40 }
 0x106   :  { %v100_v42 = vpop.f32.mrb[0].mxu0 }
 0x107   :  { %v101_v43 = vadd.f32 %v111_v41, %v100_v42  ;;  %v102_v44 = vpop.f32.mrb[1].mxu0 }
 0x108   :  { %v103_v45 = vpop.f32.mrb[2].mxu0 }
 0x109   :  { %106 = vst [vmem:[%s234_s3] sm:$0xff] %v101_v43  ;;  %v104_v46 = vpop.f32.mrb[3].mxu0 }

// kernel: fwd.19
= control target key start
LH: loop header
LB: loop body
LE: loop exit
PB: predicated region body
PF: predicated region fallthrough
CT: control target
= control target key end

     0   :  { %vm18_vm0 = vcmask 1041408   ;;  %s110_s0 = inlined_call_operand.vmem [shape: f32[10,128], index: 0, kind: input, shape index: {}]   ;;  %s111_s1 = inlined_call_operand.vmem [shape: f32[1,128], index: 1, kind: input, shape index: {}]   ;;  %s112_s2 = inlined_call_operand.vmem [shape: f32[1,128], index: 2, kind: input, shape index: {}]   ;;  %s113_s3 = inlined_call_operand.vmem [shape: f32[10,128], index: 3, kind: output, shape index: {}]  }
   0x1   :  { %v15_v0 = vld [vmem:[%s110_s0 + $0x8] sm:$0x3]  ;;  %v14_v2 = vld [vmem:[%s110_s0] sm:$0xff] }
   0x2   :  { %v19_v1 = vsel %vm18_vm0, %v15_v0, 0.0  ;;  %v66_v19 = vld [vmem:[%s111_s1] ss:$0 sm:$0xff] }
   0x3   :  { %20 = vadd.xlane.f32.xlu0 %v19_v1  ;;  %v67_v21 = vld [vmem:[%s112_s2] ss:$0 sm:$0xff] }
   0x7   :  { %16 = vadd.xlane.f32.xlu0 %v14_v2 }
  0x90   :  { %v21_v3 = vpop.xlane.xlu0 %20 }
  0x91   :  { %v24_v4 = vmul.f32 0.0078125, %v21_v3 }
  0x93   :  { %v26_v7 = vsub.f32 %v15_v0, %v24_v4 }
  0x94   :  { %v17_v5 = vpop.xlane.xlu0 %16 }
  0x95   :  { %v23_v6 = vmul.f32 0.0078125, %v17_v5  ;;  %v28_v10 = vmul.f32 %v26_v7, %v26_v7 }
  0x97   :  { %v25_v8 = vsub.f32 %v14_v2, %v23_v6  ;;  %v31_v11 = vsel %vm18_vm0, %v28_v10, 0.0 }
  0x99   :  { %v27_v9 = vmul.f32 %v25_v8, %v25_v8 }
  0x9b   :  { %29 = vadd.xlane.f32.xlu1 %v27_v9 }
  0x9f   :  { %32 = vadd.xlane.f32.xlu1 %v31_v11 }
 0x128   :  { %v30_v12 = vpop.xlane.xlu1 %29 }
 0x129   :  { %v34_v13 = vmul.f32 0.0078125, %v30_v12 }
 0x12b   :  { %v36_v14 = vadd.f32 1e-05, %v34_v13 }
 0x12c   :  { %v33_v15 = vpop.xlane.xlu1 %32 }
 0x12d   :  { %68 = vrsqrt.f32 %v36_v14  ;;  %v35_v16 = vmul.f32 0.0078125, %v33_v15 }
 0x12f   :  { %v37_v17 = vadd.f32 1e-05, %v35_v16 }
 0x131   :  { %70 = vrsqrt.f32 %v37_v17 }
 0x137   :  { %v69_v18 = vpop.eup %68 }
 0x138   :  { %v40_v20 = vmul.f32 %v69_v18, %v25_v8 }
 0x13a   :  { %v49_v22 = vmul.f32 %v66_v19, %v40_v20 }
 0x13b   :  { %v71_v23 = vpop.eup %70 }
 0x13c   :  { %v58_v24 = vadd.f32 %v67_v21, %v49_v22  ;;  %v41_v25 = vmul.f32 %v71_v23, %v26_v7 }
 0x13e   :  { %60 = vst [vmem:[%s113_s3] sm:$0xff] %v58_v24  ;;  %v50_v26 = vmul.f32 %v66_v19, %v41_v25 }
 0x140   :  { %v59_v27 = vadd.f32 %v67_v21, %v50_v26 }
 0x142   :  { %61 = vst [vmem:[%s113_s3 + $0x8] sm:$0x3] %v59_v27 }

// kernel: fwd.21
= control target key start
LH: loop header
LB: loop body
LE: loop exit
PB: predicated region body
PF: predicated region fallthrough
CT: control target
= control target key end

     0   :  { %v233_v0 = vmov 0.0   ;;  %vm234_vm0 = vmmov 0   ;;  %v235_v8 = vmov 0   ;;  %s436_s1 = inlined_call_operand.vmem [shape: f32[128,384], index: 1, kind: input, shape index: {}]   ;;  %s437_s0 = inlined_call_operand.vmem [shape: f32[10,128], index: 0, kind: input, shape index: {}]   ;;  %s438_s2 = inlined_call_operand.vmem [shape: f32[1,384], index: 2, kind: input, shape index: {}]   ;;  %s439_s3 = inlined_call_operand.vmem [shape: f32[10,384], index: 3, kind: output, shape index: {}]  }
   0x1   :  { %210 = vmatprep.subr.bf16.mxu1 %v233_v0  ;;  %v19_v1 = vld [vmem:[%s436_s1 + $0x8] sm:$0xff]  ;;  %v22_v2 = vld [vmem:[%s436_s1 + $0x20] sm:$0xff]  ;;  %v20_v3 = vld [vmem:[%s436_s1 + $0x10] sm:$0xff]  ;;  %226 = vmatprep.mubr.msk.bf16.mxu1 %vm234_vm0, %v233_v0 }
   0x2   :  { %v67_v4 = vpack.c.bf16 %v22_v2, %v19_v1  ;;  %v23_v5 = vld [vmem:[%s436_s1 + $0x28] sm:$0xff]  ;;  %v18_v6 = vld [vmem:[%s436_s1] sm:$0xff]  ;;  %v21_v7 = vld [vmem:[%s436_s1 + $0x18] sm:$0xff]  ;;  %139 = vmatprep.mubr.bf16.mxu0 %v235_v8 }
   0x3   :  { %v68_v9 = vpack.c.bf16 %v23_v5, %v20_v3  ;;  %v66_v10 = vpack.c.bf16 %v21_v7, %v18_v6  ;;  %v25_v11 = vld [vmem:[%s436_s1 + $0x38] sm:$0xff]  ;;  %v28_v12 = vld [vmem:[%s436_s1 + $0x50] sm:$0xff]  ;;  %v26_v13 = vld [vmem:[%s436_s1 + $0x40] sm:$0xff] }
   0x4   :  { %107 = vmatprep.subr.bf16.mxu0 %v67_v4  ;;  %v70_v14 = vpack.c.bf16 %v28_v12, %v25_v11  ;;  %v29_v15 = vld [vmem:[%s436_s1 + $0x58] sm:$0xff]  ;;  %v24_v16 = vld [vmem:[%s436_s1 + $0x30] sm:$0xff]  ;;  %v27_v17 = vld [vmem:[%s436_s1 + $0x48] sm:$0xff] }
   0x5   :  { %211 = vmatpush3.bf16.msra.mxu1 %v68_v9  ;;  %108 = vmatpush1.bf16.msra.mxu0 %v66_v10  ;;  %v71_v18 = vpack.c.bf16 %v29_v15, %v26_v13  ;;  %v69_v19 = vpack.c.bf16 %v27_v17, %v24_v16  ;;  %v31_v20 = vld [vmem:[%s436_s1 + $0x68] sm:$0xff]  ;;  %v34_v21 = vld [vmem:[%s436_s1 + $0x80] sm:$0xff]  ;;  %v32_v22 = vld [vmem:[%s436_s1 + $0x70] sm:$0xff] }
   0x6   :  { %212 = vmatprep.subr.bf16.mxu1 %v233_v0  ;;  %109 = vmatprep.subr.bf16.mxu0 %v70_v14  ;;  %v73_v23 = vpack.c.bf16 %v34_v21, %v31_v20  ;;  %v35_v24 = vld [vmem:[%s436_s1 + $0x88] sm:$0xff]  ;;  %v30_v25 = vld [vmem:[%s436_s1 + $0x60] sm:$0xff]  ;;  %v33_v26 = vld [vmem:[%s436_s1 + $0x78] sm:$0xff]  ;;  %v92_v14 = vlaneseq }
   0x7   :  { %v37_v27 = vld [vmem:[%s436_s1 + $0x98] sm:$0xff]  ;;  %v40_v28 = vld [vmem:[%s436_s1 + $0xb0] sm:$0xff]  ;;  %v74_v29 = vpack.c.bf16 %v35_v24, %v32_v22  ;;  %v72_v30 = vpack.c.bf16 %v33_v26, %v30_v25  ;;  %v38_v31 = vld [vmem:[%s436_s1 + $0xa0] sm:$0xff] }
   0x8   :  { %v76_v32 = vpack.c.bf16 %v40_v28, %v37_v27  ;;  %v41_v33 = vld [vmem:[%s436_s1 + $0xb8] sm:$0xff]  ;;  %v36_v34 = vld [vmem:[%s436_s1 + $0x90] sm:$0xff]  ;;  %v39_v35 = vld [vmem:[%s436_s1 + $0xa8] sm:$0xff]  ;;  %v93_v15 = vshrl.u32 %v92_v14, 7 }
   0x9   :  { %213 = vmatpush3.bf16.msra.mxu1 %v71_v18  ;;  %110 = vmatpush1.bf16.msra.mxu0 %v69_v19  ;;  %v43_v36 = vld [vmem:[%s436_s1 + $0xc8] sm:$0xff]  ;;  %v46_v37 = vld [vmem:[%s436_s1 + $0xe0] sm:$0xff]  ;;  %v77_v38 = vpack.c.bf16 %v41_v33, %v38_v31  ;;  %v75_v39 = vpack.c.bf16 %v39_v35, %v36_v34  ;;  %v44_v40 = vld [vmem:[%s436_s1 + $0xd0] sm:$0xff] }
   0xa   :  { %214 = vmatprep.subr.bf16.mxu1 %v233_v0  ;;  %111 = vmatprep.subr.bf16.mxu0 %v73_v23  ;;  %v79_v41 = vpack.c.bf16 %v46_v37, %v43_v36  ;;  %v47_v42 = vld [vmem:[%s436_s1 + $0xe8] sm:$0xff]  ;;  %v42_v43 = vld [vmem:[%s436_s1 + $0xc0] sm:$0xff]  ;;  %v45_v44 = vld [vmem:[%s436_s1 + $0xd8] sm:$0xff]  ;;  %v102_v16 = vsub.s32 2, %v93_v15  ;;  %v94_v17 = vsub.s32 0, %v93_v15  ;;  %v98_v19 = vsub.s32 1, %v93_v15 }
   0xb   :  { %v49_v45 = vld [vmem:[%s436_s1 + $0xf8] sm:$0xff]  ;;  %v52_v46 = vld [vmem:[%s436_s1 + $0x110] sm:$0xff]  ;;  %v80_v47 = vpack.c.bf16 %v47_v42, %v44_v40  ;;  %v78_v48 = vpack.c.bf16 %v45_v44, %v42_v43  ;;  %v50_v49 = vld [vmem:[%s436_s1 + $0x100] sm:$0xff] }
   0xc   :  { %v82_v50 = vpack.c.bf16 %v52_v46, %v49_v45  ;;  %v53_v51 = vld [vmem:[%s436_s1 + $0x118] sm:$0xff]  ;;  %v48_v52 = vld [vmem:[%s436_s1 + $0xf0] sm:$0xff]  ;;  %v51_v53 = vld [vmem:[%s436_s1 + $0x108] sm:$0xff] }
   0xd   :  { %215 = vmatpush3.bf16.msra.mxu1 %v74_v29  ;;  %112 = vmatpush1.bf16.msra.mxu0 %v72_v30  ;;  %v55_v54 = vld [vmem:[%s436_s1 + $0x128] sm:$0xff]  ;;  %v58_v55 = vld [vmem:[%s436_s1 + $0x140] sm:$0xff]  ;;  %v83_v56 = vpack.c.bf16 %v53_v51, %v50_v49  ;;  %v81_v57 = vpack.c.bf16 %v51_v53, %v48_v52  ;;  %v56_v58 = vld [vmem:[%s436_s1 + $0x130] sm:$0xff] }
   0xe   :  { %216 = vmatprep.subr.bf16.mxu1 %v233_v0  ;;  %113 = vmatprep.subr.bf16.mxu0 %v76_v32  ;;  %v85_v59 = vpack.c.bf16 %v58_v55, %v55_v54  ;;  %v59_v60 = vld [vmem:[%s436_s1 + $0x148] sm:$0xff]  ;;  %v54_v61 = vld [vmem:[%s436_s1 + $0x120] sm:$0xff]  ;;  %v57_v62 = vld [vmem:[%s436_s1 + $0x138] sm:$0xff] }
   0xf   :  { %v61_v63 = vld [vmem:[%s436_s1 + $0x158] sm:$0xff]  ;;  %v64_v1 = vld [vmem:[%s436_s1 + $0x170] sm:$0xff]  ;;  %v86_v2 = vpack.c.bf16 %v59_v60, %v56_v58  ;;  %v84_v3 = vpack.c.bf16 %v57_v62, %v54_v61  ;;  %v62_v4 = vld [vmem:[%s436_s1 + $0x160] sm:$0xff] }
  0x10   :  { %v88_v5 = vpack.c.bf16 %v64_v1, %v61_v63  ;;  %v65_v6 = vld [vmem:[%s436_s1 + $0x178] sm:$0xff]  ;;  %v60_v7 = vld [vmem:[%s436_s1 + $0x150] sm:$0xff]  ;;  %v63_v8 = vld [vmem:[%s436_s1 + $0x168] sm:$0xff] }
  0x11   :  { %217 = vmatpush3.bf16.msra.mxu1 %v77_v38  ;;  %114 = vmatpush1.bf16.msra.mxu0 %v75_v39  ;;  %v89_v9 = vpack.c.bf16 %v65_v6, %v62_v4  ;;  %v87_v10 = vpack.c.bf16 %v63_v8, %v60_v7  ;;  %v15_v11 = vld [vmem:[%s437_s0] sm:$0xff]  ;;  %v16_v12 = vld [vmem:[%s437_s0 + $0x8] sm:$0x3] }
  0x12   :  { %218 = vmatprep.subr.bf16.mxu1 %v233_v0  ;;  %115 = vmatprep.subr.bf16.mxu0 %v79_v41  ;;  %v17_v13 = vpack.c.bf16 %v16_v12, %v15_v11  ;;  %v90_v18 = vld [vmem:[%s438_s2] sm:$0x7] }
  0x13   :  { %v103_v20 = vrot.slane %v90_v18, %v102_v16  ;;  %v95_v21 = vrot.slane %v90_v18, %v94_v17  ;;  %v99_v22 = vrot.slane %v90_v18, %v98_v19 }
  0x15   :  { %219 = vmatpush3.bf16.msra.mxu1 %v80_v47  ;;  %116 = vmatpush1.bf16.msra.mxu0 %v78_v48 }
  0x16   :  { %220 = vmatprep.subr.bf16.mxu1 %v233_v0  ;;  %117 = vmatprep.subr.bf16.mxu0 %v82_v50 }
  0x19   :  { %221 = vmatpush3.bf16.msra.mxu1 %v83_v56  ;;  %118 = vmatpush1.bf16.msra.mxu0 %v81_v57 }
  0x1a   :  { %222 = vmatprep.subr.bf16.mxu1 %v233_v0  ;;  %119 = vmatprep.subr.bf16.mxu0 %v85_v59 }
  0x1d   :  { %223 = vmatpush3.bf16.msra.mxu1 %v86_v2  ;;  %120 = vmatpush1.bf16.msra.mxu0 %v84_v3 }
  0x1e   :  { %224 = vmatprep.subr.bf16.mxu1 %v233_v0  ;;  %121 = vmatprep.subr.bf16.mxu0 %v88_v5 }
  0x21   :  { %225 = vmatpush3.bf16.msra.mxu1 %v89_v9  ;;  %122 = vmatpush1.bf16.msra.mxu0 %v87_v10 }
  0x24   :  { %227 = vmatmul.mubr.bf16.vlgmr.msra.gmra.mrb[0].mxu1 %v17_v13  ;;  %140 = vmatmul.mubr.bf16.vlgmr.msra.gmra.mrb[0].mxu0 %v17_v13 }
  0xf7   :  { %v184_v23 = vpop.f32.mrb[0].mxu1  ;;  %v141_v0 = vpop.f32.mrb[0].mxu0 }
  0xf8   :  { %v185_v24 = vadd.f32 %v184_v23, %v103_v20  ;;  %v142_v25 = vadd.f32 %v141_v0, %v95_v21  ;;  %v228_v26 = vpop.f32.mrb[1].mxu1  ;;  %v143_v27 = vpop.f32.mrb[1].mxu0 }
  0xf9   :  { %v144_v28 = vadd.f32 %v143_v27, %v99_v22  ;;  %v187_v29 = vpop.f32.mrb[2].mxu1  ;;  %v145_v30 = vpop.f32.mrb[2].mxu0 }
  0xfa   :  { %193 = vst [vmem:[%s439_s3 + $0x10] sm:$0xff] %v185_v24  ;;  %191 = vst [vmem:[%s439_s3] sm:$0xff] %v142_v25  ;;  %v188_v31 = vadd.f32 %v187_v29, %v103_v20  ;;  %v146_v32 = vadd.f32 %v145_v30, %v95_v21  ;;  %v229_v33 = vpop.f32.mrb[3].mxu1  ;;  %v147_v34 = vpop.f32.mrb[3].mxu0 }
  0xfb   :  { %192 = vst [vmem:[%s439_s3 + $0x8] sm:$0xff] %v144_v28  ;;  %v148_v35 = vadd.f32 %v147_v34, %v99_v22 }
  0xfc   :  { %196 = vst [vmem:[%s439_s3 + $0x28] sm:$0x3] %v188_v31  ;;  %194 = vst [vmem:[%s439_s3 + $0x18] sm:$0x3] %v146_v32 }
  0xfd   :  { %195 = vst [vmem:[%s439_s3 + $0x20] sm:$0x3] %v148_v35 }

// kernel: fwd.22
= control target key start
LH: loop header
LB: loop body
LE: loop exit
PB: predicated region body
PF: predicated region fallthrough
CT: control target
= control target key end

     0   :  { %vm55_vm0 = vcmask 261120   ;;  %v1102_v0 = vmov 0.0   ;;  %vm1103_vm1 = vmmov 0   ;;  %vm424_vm2 = vcmask 36864   ;;  %s1349_s1 = inlined_call_operand.vmem [shape: f32[8,5,32], index: 1, kind: input, shape index: {}]   ;;  %s1350_s0 = inlined_call_operand.vmem [shape: f32[8,5,32], index: 0, kind: input, shape index: {}]   ;;  %s1351_s2 = inlined_call_operand.vmem [shape: f32[8,5,32], index: 2, kind: input, shape index: {}]   ;;  %s1352_s3 = inlined_call_operand.vmem [shape: f32[8,5,32], index: 3, kind: output, shape index: {}]  }
   0x1   :  { %971 = vmatprep.subr.bf16.mxu0 %v1102_v0  ;;  %977 = vmatprep.subr.bf16.mxu1 %v1102_v0  ;;  %v39_v1 = vld [vmem:[%s1349_s1] sm:$0x1f]  ;;  %v40_v2 = vld [vmem:[%s1349_s1 + $0x8] sm:$0x1f]  ;;  %v41_v7 = vld [vmem:[%s1349_s1 + $0x10] sm:$0x1f] }
   0x2   :  { %v15_v3 = vld [vmem:[%s1350_s0] sm:$0x1f]  ;;  %v47_v4 = vpack.c.bf16 %v39_v1, %v39_v1  ;;  %v48_v5 = vpack.c.bf16 %v40_v2, %v40_v2  ;;  %973 = vmatprep.mubr.msk.bf16.mxu0 %vm1103_vm1, %v1102_v0  ;;  %979 = vmatprep.mubr.msk.bf16.mxu1 %vm1103_vm1, %v1102_v0  ;;  %v16_v6 = vld [vmem:[%s1350_s0 + $0x8] sm:$0x1f]  ;;  %v42_v8 = vld [vmem:[%s1349_s1 + $0x18] sm:$0x1f]  ;;  %v49_v13 = vpack.c.bf16 %v41_v7, %v41_v7 }
   0x3   :  { %v23_v11 = vmul.f32 0.17677669, %v15_v3  ;;  %v24_v12 = vmul.f32 0.17677669, %v16_v6  ;;  %v50_v14 = vpack.c.bf16 %v42_v8, %v42_v8  ;;  %v17_v17 = vld [vmem:[%s1350_s0 + $0x10] sm:$0x1f] }
   0x4   :  { %v60_v9 = vsel %vm55_vm0, %v47_v4, 0  ;;  %v106_v10 = vsel %vm55_vm0, %v48_v5, 0  ;;  %v18_v18 = vld [vmem:[%s1350_s0 + $0x18] sm:$0x1f]  ;;  %v152_v19 = vsel %vm55_vm0, %v49_v13, 0  ;;  %vm541_vm3 = vcmask 1041408  }
   0x5   :  { %972 = vmatpush3.bf16.xpose.msra.mxu0 %v60_v9  ;;  %978 = vmatpush3.bf16.xpose.msra.mxu1 %v106_v10  ;;  %v31_v15 = vpack.c.bf16 %v23_v11, %v23_v11  ;;  %v32_v16 = vpack.c.bf16 %v24_v12, %v24_v12  ;;  %v198_v20 = vsel %vm55_vm0, %v50_v14, 0  ;;  %v43_v21 = vld [vmem:[%s1349_s1 + $0x20] sm:$0x1f]  ;;  %v44_v22 = vld [vmem:[%s1349_s1 + $0x28] sm:$0x1f]  ;;  %vm542_vm4 = vcmask 1042432  }
   0x6   :  { %983 = vmatprep.subr.bf16.mxu0 %v1102_v0  ;;  %989 = vmatprep.subr.bf16.mxu1 %v1102_v0  ;;  %v25_v23 = vmul.f32 0.17677669, %v17_v17  ;;  %v26_v24 = vmul.f32 0.17677669, %v18_v18  ;;  %v51_v25 = vpack.c.bf16 %v43_v21, %v43_v21  ;;  %v52_v26 = vpack.c.bf16 %v44_v22, %v44_v22  ;;  %v19_v29 = vld [vmem:[%s1350_s0 + $0x20] sm:$0x1f] }
   0x7   :  { %v20_v30 = vld [vmem:[%s1350_s0 + $0x28] sm:$0x1f]  ;;  %v45_v33 = vld [vmem:[%s1349_s1 + $0x30] sm:$0x1f]  ;;  %v46_v34 = vld [vmem:[%s1349_s1 + $0x38] sm:$0x1f] }
   0x8   :  { %v33_v27 = vpack.c.bf16 %v25_v23, %v25_v23  ;;  %v34_v28 = vpack.c.bf16 %v26_v24, %v26_v24  ;;  %v244_v31 = vsel %vm55_vm0, %v51_v25, 0  ;;  %v290_v32 = vsel %vm55_vm0, %v52_v26, 0  ;;  %v21_v41 = vld [vmem:[%s1350_s0 + $0x30] sm:$0x1f]  ;;  %v22_v42 = vld [vmem:[%s1350_s0 + $0x38] sm:$0x1f] }
   0x9   :  { %v27_v35 = vmul.f32 0.17677669, %v19_v29  ;;  %v28_v36 = vmul.f32 0.17677669, %v20_v30  ;;  %v53_v37 = vpack.c.bf16 %v45_v33, %v45_v33  ;;  %v54_v38 = vpack.c.bf16 %v46_v34, %v46_v34 }
   0xa   :  { %v29_v45 = vmul.f32 0.17677669, %v21_v41  ;;  %v30_v46 = vmul.f32 0.17677669, %v22_v42  ;;  %vm537_vm5 = vcmask 39936   ;;  %vm910_vm6 = vcmask 258048  }
   0xb   :  { %v35_v39 = vpack.c.bf16 %v27_v35, %v27_v35  ;;  %v36_v40 = vpack.c.bf16 %v28_v36, %v28_v36  ;;  %v336_v43 = vsel %vm55_vm0, %v53_v37, 0  ;;  %v382_v44 = vsel %vm55_vm0, %v54_v38, 0 }
   0xc   :  { %974 = vmatmul.mubr.msk.bf16.vlgmr.msra.gmra.mrb[0].mxu0 %vm55_vm0, %v31_v15  ;;  %980 = vmatmul.mubr.msk.bf16.vlgmr.msra.gmra.mrb[0].mxu1 %vm55_vm0, %v32_v16  ;;  %v37_v47 = vpack.c.bf16 %v29_v45, %v29_v45  ;;  %v38_v48 = vpack.c.bf16 %v30_v46, %v30_v46 }
   0xd   :  { %984 = vmatpush3.bf16.xpose.msra.mxu0 %v152_v19  ;;  %990 = vmatpush3.bf16.xpose.msra.mxu1 %v198_v20 }
   0xe   :  { %985 = vmatprep.mubr.msk.bf16.mxu0 %vm1103_vm1, %v1102_v0  ;;  %991 = vmatprep.mubr.msk.bf16.mxu1 %vm1103_vm1, %v1102_v0 }
   0xf   :  { %995 = vmatprep.subr.bf16.mxu0 %v1102_v0  ;;  %1001 = vmatprep.subr.bf16.mxu1 %v1102_v0 }
  0x14   :  { %986 = vmatmul.mubr.msk.bf16.vlgmr.msra.gmra.mrb[4].mxu0 %vm55_vm0, %v33_v27  ;;  %992 = vmatmul.mubr.msk.bf16.vlgmr.msra.gmra.mrb[4].mxu1 %vm55_vm0, %v34_v28 }
  0x15   :  { %996 = vmatpush3.bf16.xpose.msra.mxu0 %v244_v31  ;;  %1002 = vmatpush3.bf16.xpose.msra.mxu1 %v290_v32 }
  0x16   :  { %997 = vmatprep.mubr.msk.bf16.mxu0 %vm1103_vm1, %v1102_v0  ;;  %1003 = vmatprep.mubr.msk.bf16.mxu1 %vm1103_vm1, %v1102_v0 }
  0x17   :  { %1007 = vmatprep.subr.bf16.mxu0 %v1102_v0  ;;  %1013 = vmatprep.subr.bf16.mxu1 %v1102_v0 }
  0x1c   :  { %998 = vmatmul.mubr.msk.bf16.vlgmr.msra.gmra.mrb[8].mxu0 %vm55_vm0, %v35_v39  ;;  %1004 = vmatmul.mubr.msk.bf16.vlgmr.msra.gmra.mrb[8].mxu1 %vm55_vm0, %v36_v40 }
  0x1d   :  { %1008 = vmatpush3.bf16.xpose.msra.mxu0 %v336_v43  ;;  %1014 = vmatpush3.bf16.xpose.msra.mxu1 %v382_v44 }
  0x1e   :  { %1009 = vmatprep.mubr.msk.bf16.mxu0 %vm1103_vm1, %v1102_v0  ;;  %1015 = vmatprep.mubr.msk.bf16.mxu1 %vm1103_vm1, %v1102_v0 }
  0x1f   :  { %1019 = vmatprep.subr.bf16.mxu0 %v1102_v0  ;;  %1025 = vmatprep.subr.bf16.mxu1 %v1102_v0 }
  0x24   :  { %1010 = vmatmul.mubr.msk.bf16.vlgmr.msra.gmra.mrb[12].mxu0 %vm55_vm0, %v37_v47  ;;  %1016 = vmatmul.mubr.msk.bf16.vlgmr.msra.gmra.mrb[12].mxu1 %vm55_vm0, %v38_v48 }
  0x25   :  { %1021 = vmatprep.mubr.msk.bf16.mxu0 %vm1103_vm1, %v1102_v0  ;;  %1027 = vmatprep.mubr.msk.bf16.mxu1 %vm1103_vm1, %v1102_v0 }
  0xdf   :  { %v96_v49 = vpop.f32.mrb[0].mxu0  ;;  %v142_v50 = vpop.f32.mrb[0].mxu1 }
  0xe0   :  { %v975_v51 = vpop.f32.mrb[1].mxu0  ;;  %v425_v52 = vsel %vm424_vm2, %v96_v49, -inf  ;;  %v981_v53 = vpop.f32.mrb[1].mxu1  ;;  %v428_v58 = vsel %vm424_vm2, %v142_v50, -inf }
  0xe1   :  { %426 = vmax.xlane.f32.xlu0 %v425_v52  ;;  %v99_v54 = vpop.f32.mrb[2].mxu0  ;;  %v145_v55 = vpop.f32.mrb[2].mxu1 }
  0xe2   :  { %v976_v56 = vpop.f32.mrb[3].mxu0  ;;  %v982_v57 = vpop.f32.mrb[3].mxu1 }
  0xe5   :  { %429 = vmax.xlane.f32.xlu0 %v428_v58 }
  0xe7   :  { %v188_v59 = vpop.f32.mrb[4].mxu0  ;;  %v234_v60 = vpop.f32.mrb[4].mxu1 }
  0xe8   :  { %v987_v61 = vpop.f32.mrb[5].mxu0  ;;  %v431_v62 = vsel %vm424_vm2, %v188_v59, -inf  ;;  %v993_v63 = vpop.f32.mrb[5].mxu1  ;;  %v434_v5 = vsel %vm424_vm2, %v234_v60, -inf }
  0xe9   :  { %432 = vmax.xlane.f32.xlu1 %v431_v62  ;;  %v191_v1 = vpop.f32.mrb[6].mxu0  ;;  %v237_v2 = vpop.f32.mrb[6].mxu1  ;;  %v521_v63 = vld [vmem:[%s1351_s2] sm:$0x1f] }
  0xea   :  { %v988_v3 = vpop.f32.mrb[7].mxu0  ;;  %v994_v4 = vpop.f32.mrb[7].mxu1 }
  0xeb   :  { %v529_v3 = vpack.c.bf16 %v521_v63, %v521_v63  ;;  %v1104_v4 = vmov 65535  }
  0xed   :  { %435 = vmax.xlane.f32.xlu1 %v434_v5  ;;  %v543_v5 = vsel %vm541_vm3, 4294967295, %v1104_v4 }
  0xef   :  { %v280_v6 = vpop.f32.mrb[8].mxu0  ;;  %v326_v7 = vpop.f32.mrb[8].mxu1 }
  0xf0   :  { %v440_v8 = vsel %vm424_vm2, %v326_v7, -inf  ;;  %v437_v9 = vsel %vm424_vm2, %v280_v6, -inf  ;;  %v999_v10 = vpop.f32.mrb[9].mxu0  ;;  %v1005_v11 = vpop.f32.mrb[9].mxu1 }
  0xf1   :  { %441 = vmax.xlane.f32.xlu1 %v440_v8  ;;  %438 = vmax.xlane.f32.xlu0 %v437_v9  ;;  %v283_v12 = vpop.f32.mrb[10].mxu0  ;;  %v329_v13 = vpop.f32.mrb[10].mxu1  ;;  %v522_v9 = vld [vmem:[%s1351_s2 + $0x8] sm:$0x1f] }
  0xf2   :  { %v1000_v14 = vpop.f32.mrb[11].mxu0  ;;  %v1006_v15 = vpop.f32.mrb[11].mxu1  ;;  %v530_v10 = vpack.c.bf16 %v522_v9, %v522_v9  ;;  %v523_v12 = vld [vmem:[%s1351_s2 + $0x10] sm:$0x1f] }
  0xf3   :  { %v531_v13 = vpack.c.bf16 %v523_v12, %v523_v12  ;;  %v524_v15 = vld [vmem:[%s1351_s2 + $0x18] sm:$0x1f] }
  0xf7   :  { %v372_v16 = vpop.f32.mrb[12].mxu0  ;;  %v418_v17 = vpop.f32.mrb[12].mxu1 }
  0xf8   :  { %v446_v18 = vsel %vm424_vm2, %v418_v17, -inf  ;;  %v443_v19 = vsel %vm424_vm2, %v372_v16, -inf  ;;  %v1011_v20 = vpop.f32.mrb[13].mxu0  ;;  %v1017_v21 = vpop.f32.mrb[13].mxu1 }
  0xf9   :  { %447 = vmax.xlane.f32.xlu1 %v446_v18  ;;  %444 = vmax.xlane.f32.xlu0 %v443_v19  ;;  %v375_v22 = vpop.f32.mrb[14].mxu0  ;;  %v421_v23 = vpop.f32.mrb[14].mxu1  ;;  %v525_v18 = vld [vmem:[%s1351_s2 + $0x20] sm:$0x1f]  ;;  %v526_v21 = vld [vmem:[%s1351_s2 + $0x28] sm:$0x1f] }
  0xfa   :  { %v1012_v24 = vpop.f32.mrb[15].mxu0  ;;  %v1018_v25 = vpop.f32.mrb[15].mxu1  ;;  %v533_v19 = vpack.c.bf16 %v525_v18, %v525_v18  ;;  %v534_v22 = vpack.c.bf16 %v526_v21, %v526_v21 }
  0xfb   :  { %v527_v24 = vld [vmem:[%s1351_s2 + $0x30] sm:$0x1f] }
  0xfc   :  { %v535_v25 = vpack.c.bf16 %v527_v24, %v527_v24 }
 0x16e   :  { %v427_v26 = vpop.xlane.xlu0 %426 }
 0x16f   :  { %v449_v27 = vsub.f32 %v96_v49, %v427_v26 }
 0x171   :  { %v457_v28 = vmul.f32 1.442695, %v449_v27  ;;  %v528_v27 = vld [vmem:[%s1351_s2 + $0x38] sm:$0x1f] }
 0x172   :  { %v430_v29 = vpop.xlane.xlu0 %429 }
 0x173   :  { %1070 = vpow2.f32 %v457_v28  ;;  %v450_v30 = vsub.f32 %v142_v50, %v430_v29  ;;  %v536_v28 = vpack.c.bf16 %v528_v27, %v528_v27 }
 0x175   :  { %v459_v31 = vmul.f32 1.442695, %v450_v30 }
 0x176   :  { %v433_v32 = vpop.xlane.xlu1 %432 }
 0x177   :  { %1072 = vpow2.f32 %v459_v31  ;;  %v451_v33 = vsub.f32 %v188_v59, %v433_v32 }
 0x179   :  { %v461_v34 = vmul.f32 1.442695, %v451_v33 }
 0x17a   :  { %v436_v35 = vpop.xlane.xlu1 %435 }
 0x17b   :  { %1074 = vpow2.f32 %v461_v34  ;;  %v452_v36 = vsub.f32 %v234_v60, %v436_v35 }
 0x17d   :  { %v1227_v37 = vpop.eup %1070  ;;  %v463_v38 = vmul.f32 1.442695, %v452_v36 }
 0x17e   :  { %v442_v39 = vpop.xlane.xlu1 %441  ;;  %v439_v40 = vpop.xlane.xlu0 %438  ;;  %v473_v41 = vsel %vm424_vm2, %v1227_v37, 0.0 }
 0x17f   :  { %1076 = vpow2.f32 %v463_v38  ;;  %v454_v42 = vsub.f32 %v326_v7, %v442_v39  ;;  %v453_v43 = vsub.f32 %v280_v6, %v439_v40  ;;  %474 = vadd.xlane.f32.xlu0 %v473_v41  ;;  %v544_v7 = vsel %vm542_vm4, %v543_v5, 0 }
 0x180   :  { %v546_v8 = vand.u32 %v544_v7, %v529_v3  ;;  %v592_v11 = vand.u32 %v544_v7, %v530_v10  ;;  %v638_v14 = vand.u32 %v544_v7, %v531_v13  ;;  %v730_v20 = vand.u32 %v544_v7, %v533_v19 }
 0x181   :  { %v1231_v44 = vpop.eup %1072  ;;  %v467_v45 = vmul.f32 1.442695, %v454_v42  ;;  %v465_v46 = vmul.f32 1.442695, %v453_v43  ;;  %v776_v23 = vand.u32 %v544_v7, %v534_v22  ;;  %v822_v26 = vand.u32 %v544_v7, %v535_v25 }
 0x182   :  { %v476_v47 = vsel %vm424_vm2, %v1231_v44, 0.0  ;;  %1020 = vmatpush3.bf16.msra.mxu0 %v546_v8  ;;  %1026 = vmatpush3.bf16.msra.mxu1 %v592_v11  ;;  %v868_v29 = vand.u32 %v544_v7, %v536_v28 }
 0x183   :  { %1078 = vpow2.f32 %v467_v45  ;;  %477 = vadd.xlane.f32.xlu1 %v476_v47  ;;  %1031 = vmatprep.subr.bf16.mxu0 %v1102_v0 }
 0x184   :  { %1080 = vpow2.f32 %v465_v46  ;;  %1037 = vmatprep.subr.bf16.mxu1 %v1102_v0 }
 0x185   :  { %v1235_v48 = vpop.eup %1074 }
 0x186   :  { %v448_v49 = vpop.xlane.xlu1 %447  ;;  %v445_v50 = vpop.xlane.xlu0 %444  ;;  %v479_v51 = vsel %vm424_vm2, %v1235_v48, 0.0 }
 0x187   :  { %v456_v52 = vsub.f32 %v418_v17, %v448_v49  ;;  %v455_v53 = vsub.f32 %v372_v16, %v445_v50  ;;  %480 = vadd.xlane.f32.xlu0 %v479_v51  ;;  %v532_v16 = vpack.c.bf16 %v524_v15, %v524_v15 }
 0x189   :  { %v1239_v54 = vpop.eup %1076  ;;  %v471_v55 = vmul.f32 1.442695, %v456_v52  ;;  %v469_v56 = vmul.f32 1.442695, %v455_v53  ;;  %v684_v17 = vand.u32 %v544_v7, %v532_v16 }
 0x18a   :  { %v482_v57 = vsel %vm424_vm2, %v1239_v54, 0.0 }
 0x18b   :  { %1082 = vpow2.f32 %v471_v55  ;;  %483 = vadd.xlane.f32.xlu1 %v482_v57 }
 0x18c   :  { %1084 = vpow2.f32 %v469_v56 }
 0x18d   :  { %v1243_v58 = vpop.eup %1078 }
 0x18e   :  { %v1245_v59 = vpop.eup %1080  ;;  %v488_v60 = vsel %vm424_vm2, %v1243_v58, 0.0 }
 0x18f   :  { %489 = vadd.xlane.f32.xlu1 %v488_v60  ;;  %v485_v61 = vsel %vm424_vm2, %v1245_v59, 0.0 }
 0x190   :  { %486 = vadd.xlane.f32.xlu0 %v485_v61 }
 0x195   :  { %v1251_v62 = vpop.eup %1082 }
 0x196   :  { %v1256_v1 = vpop.eup %1084  ;;  %v494_v2 = vsel %vm424_vm2, %v1251_v62, 0.0 }
 0x197   :  { %495 = vadd.xlane.f32.xlu1 %v494_v2  ;;  %v491_v6 = vsel %vm424_vm2, %v1256_v1, 0.0 }
 0x198   :  { %492 = vadd.xlane.f32.xlu0 %v491_v6 }
 0x20c   :  { %v475_v30 = vpop.xlane.xlu0 %474 }
 0x20d   :  { %1086 = vrcp.f32 %v475_v30 }
 0x210   :  { %v478_v31 = vpop.xlane.xlu1 %477 }
 0x211   :  { %1088 = vrcp.f32 %v478_v31 }
 0x214   :  { %v481_v32 = vpop.xlane.xlu0 %480 }
 0x215   :  { %1090 = vrcp.f32 %v481_v32 }
 0x217   :  { %v1087_v33 = vpop.eup %1086 }
 0x218   :  { %v498_v34 = vmul.f32 %v1087_v33, %v1227_v37  ;;  %v484_v35 = vpop.xlane.xlu1 %483 }
 0x219   :  { %1092 = vrcp.f32 %v484_v35 }
 0x21a   :  { %v513_v36 = vpack.c.bf16 %v498_v34, %v498_v34 }
 0x21b   :  { %v1089_v38 = vpop.eup %1088 }
 0x21c   :  { %v500_v39 = vmul.f32 %v1089_v38, %v1231_v44  ;;  %v490_v40 = vpop.xlane.xlu1 %489  ;;  %1022 = vmatmul.mubr.msk.bf16.vlgmr.msra.gmra.mrb[16].mxu0 %vm537_vm5, %v513_v36 }
 0x21d   :  { %1094 = vrcp.f32 %v490_v40  ;;  %v487_v41 = vpop.xlane.xlu0 %486  ;;  %1032 = vmatpush3.bf16.msra.mxu0 %v638_v14  ;;  %1033 = vmatprep.mubr.msk.bf16.mxu0 %vm1103_vm1, %v1102_v0 }
 0x21e   :  { %1096 = vrcp.f32 %v487_v41  ;;  %v514_v42 = vpack.c.bf16 %v500_v39, %v500_v39  ;;  %1043 = vmatprep.subr.bf16.mxu0 %v1102_v0 }
 0x21f   :  { %v1091_v37 = vpop.eup %1090 }
 0x220   :  { %v502_v43 = vmul.f32 %v1091_v37, %v1235_v48  ;;  %1028 = vmatmul.mubr.msk.bf16.vlgmr.msra.gmra.mrb[16].mxu1 %vm537_vm5, %v514_v42 }
 0x221   :  { %1038 = vmatpush3.bf16.msra.mxu1 %v684_v17  ;;  %1039 = vmatprep.mubr.msk.bf16.mxu1 %vm1103_vm1, %v1102_v0 }
 0x222   :  { %v515_v44 = vpack.c.bf16 %v502_v43, %v502_v43  ;;  %1049 = vmatprep.subr.bf16.mxu1 %v1102_v0 }
 0x223   :  { %v1093_v45 = vpop.eup %1092 }
 0x224   :  { %v504_v46 = vmul.f32 %v1093_v45, %v1239_v54  ;;  %v496_v47 = vpop.xlane.xlu1 %495  ;;  %1034 = vmatmul.mubr.msk.bf16.vlgmr.msra.gmra.mrb[20].mxu0 %vm537_vm5, %v515_v44 }
 0x225   :  { %1098 = vrcp.f32 %v496_v47  ;;  %v493_v49 = vpop.xlane.xlu0 %492  ;;  %1044 = vmatpush3.bf16.msra.mxu0 %v730_v20  ;;  %1045 = vmatprep.mubr.msk.bf16.mxu0 %vm1103_vm1, %v1102_v0 }
 0x226   :  { %1100 = vrcp.f32 %v493_v49  ;;  %v516_v48 = vpack.c.bf16 %v504_v46, %v504_v46  ;;  %1055 = vmatprep.subr.bf16.mxu0 %v1102_v0 }
 0x227   :  { %v1095_v50 = vpop.eup %1094 }
 0x228   :  { %v1097_v51 = vpop.eup %1096  ;;  %1040 = vmatmul.mubr.msk.bf16.vlgmr.msra.gmra.mrb[20].mxu1 %vm537_vm5, %v516_v48  ;;  %v508_v53 = vmul.f32 %v1095_v50, %v1243_v58 }
 0x229   :  { %v506_v52 = vmul.f32 %v1097_v51, %v1245_v59  ;;  %1050 = vmatpush3.bf16.msra.mxu1 %v776_v23  ;;  %1051 = vmatprep.mubr.msk.bf16.mxu1 %vm1103_vm1, %v1102_v0 }
 0x22a   :  { %1061 = vmatprep.subr.bf16.mxu1 %v1102_v0  ;;  %v518_v55 = vpack.c.bf16 %v508_v53, %v508_v53 }
 0x22b   :  { %v517_v54 = vpack.c.bf16 %v506_v52, %v506_v52 }
 0x22d   :  { %1046 = vmatmul.mubr.msk.bf16.vlgmr.msra.gmra.mrb[24].mxu0 %vm537_vm5, %v517_v54 }
 0x22e   :  { %1056 = vmatpush3.bf16.msra.mxu0 %v822_v26  ;;  %1057 = vmatprep.mubr.msk.bf16.mxu0 %vm1103_vm1, %v1102_v0 }
 0x22f   :  { %v1099_v56 = vpop.eup %1098 }
 0x230   :  { %v1101_v57 = vpop.eup %1100  ;;  %1052 = vmatmul.mubr.msk.bf16.vlgmr.msra.gmra.mrb[24].mxu1 %vm537_vm5, %v518_v55  ;;  %v512_v58 = vmul.f32 %v1099_v56, %v1251_v62 }
 0x231   :  { %v510_v59 = vmul.f32 %v1101_v57, %v1256_v1  ;;  %1062 = vmatpush3.bf16.msra.mxu1 %v868_v29  ;;  %1063 = vmatprep.mubr.msk.bf16.mxu1 %vm1103_vm1, %v1102_v0 }
 0x232   :  { %v520_v61 = vpack.c.bf16 %v512_v58, %v512_v58 }
 0x233   :  { %v519_v60 = vpack.c.bf16 %v510_v59, %v510_v59 }
 0x235   :  { %1058 = vmatmul.mubr.msk.bf16.vlgmr.msra.gmra.mrb[28].mxu0 %vm537_vm5, %v519_v60 }
 0x238   :  { %1064 = vmatmul.mubr.msk.bf16.vlgmr.msra.gmra.mrb[28].mxu1 %vm537_vm5, %v520_v61 }
 0x2ef   :  { %v582_v63 = vpop.f32.mrb[16].mxu0 }
 0x2f0   :  { %911 = vst.msk [vmem:[%s1352_s3] sm:$0x1f] %vm910_vm6, %v582_v63  ;;  %v1023_v1 = vpop.f32.mrb[17].mxu0 }
 0x2f1   :  { %v585_v2 = vpop.f32.mrb[18].mxu0 }
 0x2f2   :  { %v1024_v3 = vpop.f32.mrb[19].mxu0 }
 0x2f3   :  { %v628_v4 = vpop.f32.mrb[16].mxu1 }
 0x2f4   :  { %912 = vst.msk [vmem:[%s1352_s3 + $0x8] sm:$0x1f] %vm910_vm6, %v628_v4  ;;  %v1029_v0 = vpop.f32.mrb[17].mxu1 }
 0x2f5   :  { %v631_v62 = vpop.f32.mrb[18].mxu1 }
 0x2f6   :  { %v1030_v5 = vpop.f32.mrb[19].mxu1 }
 0x2f7   :  { %v674_v6 = vpop.f32.mrb[20].mxu0 }
 0x2f8   :  { %913 = vst.msk [vmem:[%s1352_s3 + $0x10] sm:$0x1f] %vm910_vm6, %v674_v6  ;;  %v1035_v7 = vpop.f32.mrb[21].mxu0 }
 0x2f9   :  { %v677_v8 = vpop.f32.mrb[22].mxu0 }
 0x2fa   :  { %v1036_v9 = vpop.f32.mrb[23].mxu0 }
 0x2fb   :  { %v720_v10 = vpop.f32.mrb[20].mxu1 }
 0x2fc   :  { %914 = vst.msk [vmem:[%s1352_s3 + $0x18] sm:$0x1f] %vm910_vm6, %v720_v10  ;;  %v1041_v11 = vpop.f32.mrb[21].mxu1 }
 0x2fd   :  { %v723_v12 = vpop.f32.mrb[22].mxu1 }
 0x2fe   :  { %v1042_v13 = vpop.f32.mrb[23].mxu1 }
 0x300   :  { %v766_v14 = vpop.f32.mrb[24].mxu0 }
 0x301   :  { %915 = vst.msk [vmem:[%s1352_s3 + $0x20] sm:$0x1f] %vm910_vm6, %v766_v14  ;;  %v1047_v15 = vpop.f32.mrb[25].mxu0 }
 0x302   :  { %v769_v16 = vpop.f32.mrb[26].mxu0 }
 0x303   :  { %v1048_v17 = vpop.f32.mrb[27].mxu0  ;;  %v812_v18 = vpop.f32.mrb[24].mxu1 }
 0x304   :  { %916 = vst.msk [vmem:[%s1352_s3 + $0x28] sm:$0x1f] %vm910_vm6, %v812_v18  ;;  %v1053_v19 = vpop.f32.mrb[25].mxu1 }
 0x305   :  { %v815_v20 = vpop.f32.mrb[26].mxu1 }
 0x306   :  { %v1054_v21 = vpop.f32.mrb[27].mxu1 }
 0x308   :  { %v858_v22 = vpop.f32.mrb[28].mxu0 }
 0x309   :  { %917 = vst.msk [vmem:[%s1352_s3 + $0x30] sm:$0x1f] %vm910_vm6, %v858_v22  ;;  %v1059_v23 = vpop.f32.mrb[29].mxu0 }
 0x30a   :  { %v861_v24 = vpop.f32.mrb[30].mxu0 }
 0x30b   :  { %v1060_v25 = vpop.f32.mrb[31].mxu0  ;;  %v904_v26 = vpop.f32.mrb[28].mxu1 }
 0x30c   :  { %918 = vst.msk [vmem:[%s1352_s3 + $0x38] sm:$0x1f] %vm910_vm6, %v904_v26  ;;  %v1065_v27 = vpop.f32.mrb[29].mxu1 }
 0x30d   :  { %v907_v28 = vpop.f32.mrb[30].mxu1 }
 0x30e   :  { %v1066_v29 = vpop.f32.mrb[31].mxu1 }

// kernel: fwd.23
= control target key start
LH: loop header
LB: loop body
LE: loop exit
PB: predicated region body
PF: predicated region fallthrough
CT: control target
= control target key end

     0   :  { %v128_v0 = vmov 0.0   ;;  %vm129_vm0 = vmmov 0   ;;  %s213_s1 = inlined_call_operand.vmem [shape: f32[128,128], index: 1, kind: input, shape index: {}]   ;;  %s214_s0 = inlined_call_operand.vmem [shape: f32[10,128], index: 0, kind: input, shape index: {}]   ;;  %s215_s2 = inlined_call_operand.vmem [shape: f32[1,128], index: 2, kind: input, shape index: {}]   ;;  %s216_s3 = inlined_call_operand.vmem [shape: f32[10,128], index: 3, kind: output, shape index: {}]  }
   0x1   :  { %106 = vmatprep.subr.bf16.mxu0 %v128_v0  ;;  %v18_v1 = vld [vmem:[%s213_s1] sm:$0xff]  ;;  %v19_v2 = vld [vmem:[%s213_s1 + $0x8] sm:$0xff]  ;;  %v20_v3 = vld [vmem:[%s213_s1 + $0x10] sm:$0xff]  ;;  %122 = vmatprep.mubr.msk.bf16.mxu0 %vm129_vm0, %v128_v0 }
   0x2   :  { %v34_v4 = vpack.c.bf16 %v19_v2, %v18_v1  ;;  %v21_v5 = vld [vmem:[%s213_s1 + $0x18] sm:$0xff]  ;;  %v22_v7 = vld [vmem:[%s213_s1 + $0x20] sm:$0xff]  ;;  %v23_v8 = vld [vmem:[%s213_s1 + $0x28] sm:$0xff] }
   0x3   :  { %v35_v6 = vpack.c.bf16 %v21_v5, %v20_v3  ;;  %v36_v9 = vpack.c.bf16 %v23_v8, %v22_v7  ;;  %v24_v10 = vld [vmem:[%s213_s1 + $0x30] sm:$0xff]  ;;  %v25_v11 = vld [vmem:[%s213_s1 + $0x38] sm:$0xff]  ;;  %v26_v13 = vld [vmem:[%s213_s1 + $0x40] sm:$0xff] }
   0x4   :  { %107 = vmatpush3.bf16.msra.mxu0 %v34_v4  ;;  %v37_v12 = vpack.c.bf16 %v25_v11, %v24_v10  ;;  %v27_v14 = vld [vmem:[%s213_s1 + $0x48] sm:$0xff]  ;;  %v28_v16 = vld [vmem:[%s213_s1 + $0x50] sm:$0xff]  ;;  %v29_v17 = vld [vmem:[%s213_s1 + $0x58] sm:$0xff] }
   0x5   :  { %108 = vmatprep.subr.bf16.mxu0 %v128_v0  ;;  %v38_v15 = vpack.c.bf16 %v27_v14, %v26_v13  ;;  %v39_v18 = vpack.c.bf16 %v29_v17, %v28_v16  ;;  %v30_v19 = vld [vmem:[%s213_s1 + $0x60] sm:$0xff]  ;;  %v31_v20 = vld [vmem:[%s213_s1 + $0x68] sm:$0xff]  ;;  %v32_v22 = vld [vmem:[%s213_s1 + $0x70] sm:$0xff] }
   0x6   :  { %v40_v21 = vpack.c.bf16 %v31_v20, %v30_v19  ;;  %v33_v23 = vld [vmem:[%s213_s1 + $0x78] sm:$0xff]  ;;  %v15_v25 = vld [vmem:[%s214_s0] sm:$0xff]  ;;  %v16_v26 = vld [vmem:[%s214_s0 + $0x8] sm:$0x3] }
   0x7   :  { %v41_v24 = vpack.c.bf16 %v33_v23, %v32_v22  ;;  %v17_v27 = vpack.c.bf16 %v16_v26, %v15_v25  ;;  %v96_v28 = vld [vmem:[%s215_s2] ss:$0 sm:$0xff] }
   0x8   :  { %109 = vmatpush3.bf16.msra.mxu0 %v35_v6 }
   0x9   :  { %110 = vmatprep.subr.bf16.mxu0 %v128_v0 }
   0xc   :  { %111 = vmatpush3.bf16.msra.mxu0 %v36_v9 }
   0xd   :  { %112 = vmatprep.subr.bf16.mxu0 %v128_v0 }
  0x10   :  { %113 = vmatpush3.bf16.msra.mxu0 %v37_v12 }
  0x11   :  { %114 = vmatprep.subr.bf16.mxu0 %v128_v0 }
  0x14   :  { %115 = vmatpush3.bf16.msra.mxu0 %v38_v15 }
  0x15   :  { %116 = vmatprep.subr.bf16.mxu0 %v128_v0 }
  0x18   :  { %117 = vmatpush3.bf16.msra.mxu0 %v39_v18 }
  0x19   :  { %118 = vmatprep.subr.bf16.mxu0 %v128_v0 }
  0x1c   :  { %119 = vmatpush3.bf16.msra.mxu0 %v40_v21 }
  0x1d   :  { %120 = vmatprep.subr.bf16.mxu0 %v128_v0 }
  0x20   :  { %121 = vmatpush3.bf16.msra.mxu0 %v41_v24 }
  0x23   :  { %123 = vmatmul.mubr.bf16.vlgmr.msra.gmra.mrb[0].mxu0 %v17_v27 }
  0xf6   :  { %v83_v29 = vpop.f32.mrb[0].mxu0 }
  0xf7   :  { %v84_v30 = vadd.f32 %v96_v28, %v83_v29  ;;  %v124_v31 = vpop.f32.mrb[1].mxu0 }
  0xf8   :  { %v86_v32 = vpop.f32.mrb[2].mxu0 }
  0xf9   :  { %90 = vst [vmem:[%s216_s3] sm:$0xff] %v84_v30  ;;  %v87_v33 = vadd.f32 %v96_v28, %v86_v32  ;;  %v125_v34 = vpop.f32.mrb[3].mxu0 }
  0xfb   :  { %91 = vst [vmem:[%s216_s3 + $0x8] sm:$0x3] %v87_v33 }

// kernel: fwd.26
= control target key start
LH: loop header
LB: loop body
LE: loop exit
PB: predicated region body
PF: predicated region fallthrough
CT: control target
= control target key end

     0   :  { %s658_s12 = smov 0   ;;  %s660_s13 = smov 0   ;;  %s774_s0 = inlined_call_operand.vmem [shape: f32[10,512], index: 0, kind: input, shape index: {}]   ;;  %s775_s1 = inlined_call_operand.vmem [shape: f32[512,128], index: 1, kind: input, shape index: {}]   ;;  %s776_s2 = inlined_call_operand.vmem [shape: f32[1,128], index: 2, kind: input, shape index: {}]   ;;  %s777_s3 = inlined_call_operand.vmem [shape: f32[10,128], index: 3, kind: output, shape index: {}]  }
   0x1   :  { %s662_s14 = smov 0   ;;  %s664_s15 = smov 0  }
   0x2   :  { %s666_s16 = smov 0  }
   0x3 LB: > { %s25_s17 = sadd.s32 1, %s631_s15  ;;  %p48_p1 = scmp.ne.s32.totalorder %s623_s13, %s619_s12  ;;  %s635_s16 = sphi %s666_s16, %s13_s16   ;;  %s631_s15 = sphi %s664_s15, %s781_s15   ;;  %s627_s14 = sphi %s662_s14, %s780_s14   ;;  %s623_s13 = sphi %s660_s13, %s779_s13   ;;  %s619_s12 = sphi %s658_s12, %s778_s12  }
   0x4   : > { %p26_p0 = scmp.ge.s32.totalorder %s25_s17, 2  ;;  %p49_p2 = scmp.eq.s32.totalorder %s635_s16, 0 }
   0x5   : > { %s41_s19 = sadd.s32 1, %s623_s13  ;;  %p518_p5 = scmp.ge.s32.totalorder %s635_s16, 2 }
   0x6   : > { %s783_s17 = smov (%p26_p0, %s25_s17), 0  ;;  %p50_p3 = por %p49_p2, %p48_p1 }
   0x7   : > { %s37_s18 = ssub.s32 %s631_s15, %s783_s17  ;;  %162 = sbr.rel (%p518_p5) target bundleno = 21 (0x15), region = 20 }
   0x8   : > { %p39_p4 = scmp.eq.s32.totalorder %s37_s18, 0 }
   0xa   : > { %s693_s20 = scalar_select %p39_p4, %s623_s13, %s41_s19  }
   0xe   : > { %165 = sbr.rel (!%p50_p3) target bundleno = 21 (0x15), region = 24  ;;  %s167_s21 = sand.u32 (%p50_p3), 1, %s623_s13  }
   0xf   : > { %s533_s22 = sshll.u32 (%p50_p3), %s631_s15, 4  ;;  %s519_s23 = sshll.u32 (%p50_p3), %s167_s21, 5 }
  0x10   : > { %s175_s26 = scalar_lea.vmem (%p50_p3), %s774_s0, %s533_s22  ;;  %s169_s27 = scalar_lea.vmem (%p50_p3), [#allocation3], %s519_s23 }
  0x11   : > { %v188_v0 = vld [vmem:[%s175_s26] sm:$0xff] (%p50_p3)  ;;  %v190_v1 = vld [vmem:[%s175_s26 + $0x8] sm:$0xff] (%p50_p3) }
  0x12   : > { %v192_v2 = vld [vmem:[%s175_s26 + $0x20] sm:$0xff] (%p50_p3)  ;;  %189 = vst [vmem:[%s169_s27] sm:$0xff] (%p50_p3), %v188_v0  ;;  %191 = vst [vmem:[%s169_s27 + $0x8] sm:$0xff] (%p50_p3), %v190_v1  ;;  %v194_v3 = vld [vmem:[%s175_s26 + $0x28] sm:$0xff] (%p50_p3) }
  0x13   : > { %193 = vst [vmem:[%s169_s27 + $0x10] sm:$0xff] (%p50_p3), %v192_v2  ;;  %195 = vst [vmem:[%s169_s27 + $0x18] sm:$0xff] (%p50_p3), %v194_v3 }
  0x15 PF: > { %p522_p6 = scmp.ge.s32.totalorder %s635_s16, 1  ;;  %p212_p7 = scmp.lt.s32.totalorder %s635_s16, 3 }
  0x17   : > { %p213_p8 = pnand %p522_p6, %p212_p7 }
  0x18   : > { %s219_s28 = sand.u32 (!%p213_p8), 1, %s619_s12   ;;  %s524_s29 = sshll.u32 (!%p213_p8), %s627_s14, 5 }
  0x19   : > { %216 = sbr.rel (%p213_p8) target bundleno = 304 (0x130), region = 51  ;;  %s523_s30 = sshll.u32 (!%p213_p8), %s219_s28, 5 }
  0x1a   : > { %p259_p9 = scmp.lt.s32.totalorder (!%p213_p8), %s524_s29, 63  ;;  %s710_s8 = scalar_lea.vmem (!%p213_p8), [#allocation3], %s523_s30 }
  0x1b   : > { %p526_p10 = scmp.ne.s32.totalorder (!%p213_p8), %s627_s14, 0 }
  0x20   : > { %s785_s29 = smov (!%p259_p9, %s524_s29), 63  ;;  %283 = sbr.rel (%p526_p10) target bundleno = 39 (0x27), region = 59 }
  0x21   : > { %s525_s4 = sshll.u32 %s785_s29, 3  ;;  %v637_v4 = vmov (!%p526_p10), 0.0  }
  0x22   : > { %s708_s7 = scalar_lea.vmem %s775_s1, %s525_s4  ;;  %284 = vst [vmem:[#allocation2] sm:$0xff] (!%p526_p10), %v637_v4  ;;  %285 = vst [vmem:[#allocation2 + $0x8] sm:$0x3] (!%p526_p10), %v637_v4 }
  0x27 PF: > { %v310_v5 = vld [vmem:[%s708_s7 + $0x80] sm:$0xff]  ;;  %v311_v6 = vld [vmem:[%s708_s7 + $0x88] sm:$0xff]  ;;  %v312_v10 = vld [vmem:[%s708_s7 + $0x90] sm:$0xff]  ;;  %p527_p11 = scmp.ne.s32.totalorder %s627_s14, 1 }
  0x28   : > { %v294_v7 = vld [vmem:[%s708_s7] sm:$0xff]  ;;  %v334_v8 = vpack.c.bf16 %v311_v6, %v310_v5  ;;  %v295_v9 = vld [vmem:[%s708_s7 + $0x8] sm:$0xff]  ;;  %v313_v11 = vld [vmem:[%s708_s7 + $0x98] sm:$0xff] }
  0x29   : > { %v326_v12 = vpack.c.bf16 %v295_v9, %v294_v7  ;;  %v335_v13 = vpack.c.bf16 %v313_v11, %v312_v10  ;;  %v296_v14 = vld [vmem:[%s708_s7 + $0x10] sm:$0xff]  ;;  %v297_v15 = vld [vmem:[%s708_s7 + $0x18] sm:$0xff]  ;;  %v314_v16 = vld [vmem:[%s708_s7 + $0xa0] sm:$0xff] }
  0x2a   : > { %534 = vmatprep.subr.bf16.mxu0 %v334_v8  ;;  %v315_v17 = vld [vmem:[%s708_s7 + $0xa8] sm:$0xff]  ;;  %v327_v18 = vpack.c.bf16 %v297_v15, %v296_v14  ;;  %v298_v20 = vld [vmem:[%s708_s7 + $0x20] sm:$0xff]  ;;  %v316_v22 = vld [vmem:[%s708_s7 + $0xb0] sm:$0xff] }
  0x2b   : > { %535 = vmatpush3.bf16.msra.mxu0 %v326_v12  ;;  %v336_v19 = vpack.c.bf16 %v315_v17, %v314_v16  ;;  %v299_v21 = vld [vmem:[%s708_s7 + $0x28] sm:$0xff]  ;;  %v317_v23 = vld [vmem:[%s708_s7 + $0xb8] sm:$0xff]  ;;  %v300_v26 = vld [vmem:[%s708_s7 + $0x30] sm:$0xff] }
  0x2c   : > { %536 = vmatprep.subr.bf16.mxu0 %v335_v13  ;;  %v328_v24 = vpack.c.bf16 %v299_v21, %v298_v20  ;;  %v337_v25 = vpack.c.bf16 %v317_v23, %v316_v22  ;;  %v301_v27 = vld [vmem:[%s708_s7 + $0x38] sm:$0xff]  ;;  %v318_v28 = vld [vmem:[%s708_s7 + $0xc0] sm:$0xff]  ;;  %v319_v29 = vld [vmem:[%s708_s7 + $0xc8] sm:$0xff] }
  0x2d   : > { %v289_v30 = vld [vmem:[%s710_s8 + $0x8] sm:$0xff]  ;;  %v291_v31 = vld [vmem:[%s710_s8 + $0x18] sm:$0x3]  ;;  %v329_v32 = vpack.c.bf16 %v301_v27, %v300_v26  ;;  %v338_v34 = vpack.c.bf16 %v319_v29, %v318_v28  ;;  %v302_v35 = vld [vmem:[%s708_s7 + $0x40] sm:$0xff] }
  0x2e   : > { %v293_v33 = vpack.c.bf16 %v291_v31, %v289_v30  ;;  %v303_v36 = vld [vmem:[%s708_s7 + $0x48] sm:$0xff]  ;;  %v320_v37 = vld [vmem:[%s708_s7 + $0xd0] sm:$0xff]  ;;  %v321_v38 = vld [vmem:[%s708_s7 + $0xd8] sm:$0xff] }
  0x2f   : > { %537 = vmatpush3.bf16.msra.mxu0 %v327_v18  ;;  %v330_v39 = vpack.c.bf16 %v303_v36, %v302_v35  ;;  %v339_v40 = vpack.c.bf16 %v321_v38, %v320_v37  ;;  %v304_v41 = vld [vmem:[%s708_s7 + $0x50] sm:$0xff]  ;;  %v305_v42 = vld [vmem:[%s708_s7 + $0x58] sm:$0xff]  ;;  %v322_v43 = vld [vmem:[%s708_s7 + $0xe0] sm:$0xff] }
  0x30   : > { %538 = vmatprep.subr.bf16.mxu0 %v336_v19  ;;  %374 = vmatprep.mubr.bf16.mxu0 %v293_v33  ;;  %v323_v44 = vld [vmem:[%s708_s7 + $0xe8] sm:$0xff]  ;;  %v331_v45 = vpack.c.bf16 %v305_v42, %v304_v41  ;;  %v306_v47 = vld [vmem:[%s708_s7 + $0x60] sm:$0xff]  ;;  %v324_v49 = vld [vmem:[%s708_s7 + $0xf0] sm:$0xff] }
  0x31   : > { %v340_v46 = vpack.c.bf16 %v323_v44, %v322_v43  ;;  %v307_v48 = vld [vmem:[%s708_s7 + $0x68] sm:$0xff]  ;;  %v325_v50 = vld [vmem:[%s708_s7 + $0xf8] sm:$0xff]  ;;  %v308_v53 = vld [vmem:[%s708_s7 + $0x70] sm:$0xff] }
  0x32   : > { %v332_v51 = vpack.c.bf16 %v307_v48, %v306_v47  ;;  %v341_v52 = vpack.c.bf16 %v325_v50, %v324_v49  ;;  %v309_v54 = vld [vmem:[%s708_s7 + $0x78] sm:$0xff]  ;;  %v288_v56 = vld [vmem:[%s710_s8] sm:$0xff]  ;;  %v290_v57 = vld [vmem:[%s710_s8 + $0x10] sm:$0x3] }
  0x33   : > { %539 = vmatpush3.bf16.msra.mxu0 %v328_v24  ;;  %v333_v55 = vpack.c.bf16 %v309_v54, %v308_v53  ;;  %v292_v58 = vpack.c.bf16 %v290_v57, %v288_v56  ;;  %v286_v60 = vld [vmem:[#allocation2] sm:$0xff]  ;;  %v287_v0 = vld [vmem:[#allocation2 + $0x8] sm:$0x3] }
  0x34   : > { %540 = vmatprep.subr.bf16.mxu0 %v337_v25  ;;  %v528_v6 = vld [vmem:[%s776_s2] ss:$0 sm:$0xff] (!%p527_p11) }
  0x37   : > { %541 = vmatpush3.bf16.msra.mxu0 %v329_v32 }
  0x38   : > { %542 = vmatprep.subr.bf16.mxu0 %v338_v34 }
  0x3b   : > { %543 = vmatpush3.bf16.msra.mxu0 %v330_v39 }
  0x3c   : > { %544 = vmatprep.subr.bf16.mxu0 %v339_v40 }
  0x3f   : > { %545 = vmatpush3.bf16.msra.mxu0 %v331_v45 }
  0x40   : > { %546 = vmatprep.subr.bf16.mxu0 %v340_v46 }
  0x43   : > { %547 = vmatpush3.bf16.msra.mxu0 %v332_v51 }
  0x44   : > { %548 = vmatprep.subr.bf16.mxu0 %v341_v52 }
  0x47   : > { %549 = vmatpush3.bf16.msra.mxu0 %v333_v55 }
  0x4a   : > { %375 = vmatmul.mubr.bf16.vlgmr.msra.gmra.mrb[0].mxu0 %v292_v58 }
 0x11d   : > { %v550_v59 = vpop.f32.mrb[0].mxu0 }
 0x11e   : > { %v551_v61 = vpop.f32.mrb[1].mxu0 }
 0x11f   : > { %v552_v62 = vadd.f32 %v551_v61, %v550_v59  ;;  %v553_v63 = vpop.f32.mrb[2].mxu0  ;;  %390 = sbr.rel (%p527_p11) target bundleno = 304 (0x130), region = 63 }
 0x120   : > { %v554_v1 = vpop.f32.mrb[3].mxu0 }
 0x121   : > { %v383_v2 = vadd.f32 %v552_v62, %v286_v60  ;;  %v555_v3 = vadd.f32 %v554_v1, %v553_v63 }
 0x123   : > { %385 = vst [vmem:[#allocation2] sm:$0xff] %v383_v2  ;;  %v384_v4 = vadd.f32 %v555_v3, %v287_v0 }
 0x125   : > { %386 = vst [vmem:[#allocation2 + $0x8] sm:$0x3] %v384_v4 }
 0x12a   : > { %v391_v5 = vld [vmem:[#allocation2] sm:$0xff] }
 0x12b   : > { %v400_v8 = vadd.f32 %v528_v6, %v391_v5 }
 0x12c   : > { %v392_v7 = vld [vmem:[#allocation2 + $0x8] sm:$0x3] }
 0x12d   : > { %v401_v9 = vadd.f32 %v528_v6, %v392_v7  ;;  %402 = vst [vmem:[%s777_s3] sm:$0xff] %v400_v8 }
 0x12f   : > { %403 = vst [vmem:[%s777_s3 + $0x8] sm:$0x3] %v401_v9 }
 0x130 PF: > { %s13_s16 = sadd.s32 1, %s635_s16   ;;  %s778_s12 = smov %s623_s13 }
 0x131   : > { %p10_p12 = scmp.ge.s32.totalorder %s13_s16, 4   ;;  %s779_s13 = smov %s693_s20 }
 0x132   : > { %s780_s14 = smov %s631_s15  ;;  %s781_s15 = smov %s783_s17 }
 0x133   :  { %12 = sbr.rel (!%p10_p12) target bundleno = 3 (0x3), region = 104 }

// kernel: fwd.25
= control target key start
LH: loop header
LB: loop body
LE: loop exit
PB: predicated region body
PF: predicated region fallthrough
CT: control target
= control target key end

     0   :  { %s775_s12 = smov 0   ;;  %s777_s13 = smov 0   ;;  %s963_s0 = inlined_call_operand.vmem [shape: f32[10,128], index: 0, kind: input, shape index: {}]   ;;  %s964_s1 = inlined_call_operand.vmem [shape: f32[128,512], index: 1, kind: input, shape index: {}]   ;;  %s965_s2 = inlined_call_operand.vmem [shape: f32[1,512], index: 2, kind: input, shape index: {}]   ;;  %s966_s3 = inlined_call_operand.vmem [shape: f32[10,512], index: 3, kind: output, shape index: {}]  }
   0x1   :  { %s779_s14 = smov 0   ;;  %s781_s15 = smov 0  }
   0x2   :  { %s783_s16 = smov 0  }
   0x3 LB: > { %s28_s17 = sadd.s32 1, %s747_s15  ;;  %s644_s18 = sadd.s32 4294967295, %s751_s16   ;;  %s751_s16 = sphi %s783_s16, %s13_s16   ;;  %s747_s15 = sphi %s781_s15, %s971_s15   ;;  %s743_s14 = sphi %s779_s14, %s970_s14   ;;  %s739_s13 = sphi %s777_s13, %s969_s13   ;;  %s735_s12 = sphi %s775_s12, %s968_s12  }
   0x4   : > { %p30_p0 = scmp.ge.s32.totalorder %s28_s17, 2  ;;  %p76_p1 = scmp.ne.s32.totalorder %s739_s13, %s735_s12 }
   0x5   : > { %p77_p2 = scmp.eq.s32.totalorder %s751_s16, 0  ;;  %p134_p4 = scmp.eq.s32.totalorder %s644_s18, 1 }
   0x6   : > { %s973_s17 = smov (%p30_p0, %s28_s17), 0  ;;  %s69_s20 = sadd.s32 1, %s739_s13 }
   0x7   : > { %p78_p3 = por %p77_p2, %p76_p1  ;;  %s65_s19 = ssub.s32 %s747_s15, %s973_s17 }
   0x8   : > { %p67_p5 = scmp.eq.s32.totalorder %s65_s19, 0  ;;  %p810_p6 = por %p134_p4, %p76_p1 }
   0x9   : > { %p648_p7 = scmp.ge.s32.totalorder %s751_s16, 2 }
   0xa   : > { %s815_s22 = scalar_select %p67_p5, %s739_s13, %s69_s20  }
   0xb   : > { %168 = sbr.rel (%p648_p7) target bundleno = 38 (0x26), region = 20 }
  0x12   : > { %171 = sbr.rel (!%p78_p3) target bundleno = 38 (0x26), region = 24  ;;  %s173_s23 = sand.u32 (%p78_p3), 1, %s739_s13  }
  0x13   : > { %s661_s24 = sshll.u32 (%p78_p3), %s747_s15, 4  ;;  %s649_s25 = sshll.u32 (%p78_p3), %s173_s23, 8 }
  0x14   : > { %s823_s28 = scalar_lea.vmem (%p78_p3), %s964_s1, %s661_s24  ;;  %s828_s29 = scalar_lea.vmem (%p78_p3), [#allocation3], %s649_s25 }
  0x15   : > { %v194_v0 = vld [vmem:[%s823_s28] sm:$0xff] (%p78_p3)  ;;  %v196_v1 = vld [vmem:[%s823_s28 + $0x8] sm:$0xff] (%p78_p3) }
  0x16   : > { %v198_v2 = vld [vmem:[%s823_s28 + $0x20] sm:$0xff] (%p78_p3)  ;;  %195 = vst [vmem:[%s828_s29] sm:$0xff] (%p78_p3), %v194_v0  ;;  %197 = vst [vmem:[%s828_s29 + $0x8] sm:$0xff] (%p78_p3), %v196_v1  ;;  %v200_v3 = vld [vmem:[%s823_s28 + $0x28] sm:$0xff] (%p78_p3) }
  0x17   : > { %199 = vst [vmem:[%s828_s29 + $0x10] sm:$0xff] (%p78_p3), %v198_v2  ;;  %v202_v4 = vld [vmem:[%s823_s28 + $0x40] sm:$0xff] (%p78_p3)  ;;  %v204_v5 = vld [vmem:[%s823_s28 + $0x48] sm:$0xff] (%p78_p3)  ;;  %201 = vst [vmem:[%s828_s29 + $0x18] sm:$0xff] (%p78_p3), %v200_v3 }
  0x18   : > { %203 = vst [vmem:[%s828_s29 + $0x20] sm:$0xff] (%p78_p3), %v202_v4  ;;  %205 = vst [vmem:[%s828_s29 + $0x28] sm:$0xff] (%p78_p3), %v204_v5  ;;  %v206_v6 = vld [vmem:[%s823_s28 + $0x60] sm:$0xff] (%p78_p3)  ;;  %v208_v7 = vld [vmem:[%s823_s28 + $0x68] sm:$0xff] (%p78_p3) }
  0x19   : > { %v210_v8 = vld [vmem:[%s823_s28 + $0x80] sm:$0xff]  ;;  %207 = vst [vmem:[%s828_s29 + $0x30] sm:$0xff] %v206_v6  ;;  %209 = vst [vmem:[%s828_s29 + $0x38] sm:$0xff] %v208_v7  ;;  %v212_v9 = vld [vmem:[%s823_s28 + $0x88] sm:$0xff] }
  0x1a   : > { %211 = vst [vmem:[%s828_s29 + $0x40] sm:$0xff] %v210_v8  ;;  %v214_v10 = vld [vmem:[%s823_s28 + $0xa0] sm:$0xff]  ;;  %v216_v11 = vld [vmem:[%s823_s28 + $0xa8] sm:$0xff]  ;;  %213 = vst [vmem:[%s828_s29 + $0x48] sm:$0xff] %v212_v9 }
  0x1b   : > { %215 = vst [vmem:[%s828_s29 + $0x50] sm:$0xff] %v214_v10  ;;  %217 = vst [vmem:[%s828_s29 + $0x58] sm:$0xff] %v216_v11  ;;  %v218_v12 = vld [vmem:[%s823_s28 + $0xc0] sm:$0xff]  ;;  %v220_v13 = vld [vmem:[%s823_s28 + $0xc8] sm:$0xff] }
  0x1c   : > { %v222_v14 = vld [vmem:[%s823_s28 + $0xe0] sm:$0xff]  ;;  %219 = vst [vmem:[%s828_s29 + $0x60] sm:$0xff] %v218_v12  ;;  %221 = vst [vmem:[%s828_s29 + $0x68] sm:$0xff] %v220_v13  ;;  %v224_v15 = vld [vmem:[%s823_s28 + $0xe8] sm:$0xff] }
  0x1d   : > { %223 = vst [vmem:[%s828_s29 + $0x70] sm:$0xff] %v222_v14  ;;  %v226_v16 = vld [vmem:[%s823_s28 + $0x100] sm:$0xff]  ;;  %v228_v17 = vld [vmem:[%s823_s28 + $0x108] sm:$0xff]  ;;  %225 = vst [vmem:[%s828_s29 + $0x78] sm:$0xff] %v224_v15 }
  0x1e   : > { %227 = vst [vmem:[%s828_s29 + $0x80] sm:$0xff] %v226_v16  ;;  %229 = vst [vmem:[%s828_s29 + $0x88] sm:$0xff] %v228_v17  ;;  %v230_v18 = vld [vmem:[%s823_s28 + $0x120] sm:$0xff]  ;;  %v232_v19 = vld [vmem:[%s823_s28 + $0x128] sm:$0xff] }
  0x1f   : > { %v234_v20 = vld [vmem:[%s823_s28 + $0x140] sm:$0xff]  ;;  %231 = vst [vmem:[%s828_s29 + $0x90] sm:$0xff] %v230_v18  ;;  %233 = vst [vmem:[%s828_s29 + $0x98] sm:$0xff] %v232_v19  ;;  %v236_v21 = vld [vmem:[%s823_s28 + $0x148] sm:$0xff] }
  0x20   : > { %235 = vst [vmem:[%s828_s29 + $0xa0] sm:$0xff] %v234_v20  ;;  %v238_v22 = vld [vmem:[%s823_s28 + $0x160] sm:$0xff]  ;;  %v240_v23 = vld [vmem:[%s823_s28 + $0x168] sm:$0xff]  ;;  %237 = vst [vmem:[%s828_s29 + $0xa8] sm:$0xff] %v236_v21 }
  0x21   : > { %239 = vst [vmem:[%s828_s29 + $0xb0] sm:$0xff] %v238_v22  ;;  %241 = vst [vmem:[%s828_s29 + $0xb8] sm:$0xff] %v240_v23  ;;  %v242_v24 = vld [vmem:[%s823_s28 + $0x180] sm:$0xff]  ;;  %v244_v25 = vld [vmem:[%s823_s28 + $0x188] sm:$0xff] }
  0x22   : > { %v246_v26 = vld [vmem:[%s823_s28 + $0x1a0] sm:$0xff]  ;;  %243 = vst [vmem:[%s828_s29 + $0xc0] sm:$0xff] %v242_v24  ;;  %245 = vst [vmem:[%s828_s29 + $0xc8] sm:$0xff] %v244_v25  ;;  %v248_v27 = vld [vmem:[%s823_s28 + $0x1a8] sm:$0xff] }
  0x23   : > { %247 = vst [vmem:[%s828_s29 + $0xd0] sm:$0xff] %v246_v26  ;;  %v250_v28 = vld [vmem:[%s823_s28 + $0x1c0] sm:$0xff]  ;;  %v252_v29 = vld [vmem:[%s823_s28 + $0x1c8] sm:$0xff]  ;;  %249 = vst [vmem:[%s828_s29 + $0xd8] sm:$0xff] %v248_v27 }
  0x24   : > { %251 = vst [vmem:[%s828_s29 + $0xe0] sm:$0xff] %v250_v28  ;;  %253 = vst [vmem:[%s828_s29 + $0xe8] sm:$0xff] %v252_v29  ;;  %v254_v30 = vld [vmem:[%s823_s28 + $0x1e0] sm:$0xff]  ;;  %v256_v31 = vld [vmem:[%s823_s28 + $0x1e8] sm:$0xff] }
  0x25   : > { %255 = vst [vmem:[%s828_s29 + $0xf0] sm:$0xff] %v254_v30  ;;  %257 = vst [vmem:[%s828_s29 + $0xf8] sm:$0xff] %v256_v31 }
  0x26 PF: > { %p652_p8 = scmp.ge.s32.totalorder %s751_s16, 1  ;;  %p270_p9 = scmp.lt.s32.totalorder %s751_s16, 3 }
  0x28   : > { %p271_p10 = pnand %p652_p8, %p270_p9 }
  0x29   : > { %s277_s30 = sand.u32 (!%p271_p10), 1, %s735_s12   ;;  %v753_v32 = vmov (!%p271_p10), 0   ;;  %v754_v33 = vmov (!%p271_p10), 0.0   ;;  %v342_v18 = vld [vmem:[%s963_s0] sm:$0xff] (!%p271_p10)  ;;  %v343_v19 = vld [vmem:[%s963_s0 + $0x8] sm:$0x3] (!%p271_p10)  ;;  %v453_v21 = vlaneseq (!%p271_p10) }
  0x2a   : > { %274 = sbr.rel (%p271_p10) target bundleno = 340 (0x154), region = 51  ;;  %s653_s4 = sshll.u32 (!%p271_p10), %s277_s30, 8  ;;  %425 = vmatprep.mubr.bf16.mxu0 (!%p271_p10), %v753_v32  ;;  %336 = vst [vmem:[#allocation2 + $0x10] sm:$0x3] (!%p271_p10), %v754_v33  ;;  %337 = vst [vmem:[#allocation2 + $0x18] sm:$0x3] (!%p271_p10), %v754_v33  ;;  %v344_v20 = vpack.c.bf16 (!%p271_p10), %v343_v19, %v342_v18 }
  0x2b   : > { %s896_s5 = scalar_lea.vmem (!%p271_p10), [#allocation3], %s653_s4  ;;  %s655_s10 = sshll.u32 (!%p271_p10), %s743_s14, 1  ;;  %v454_v22 = vshrl.u32 (!%p271_p10), %v453_v21, 7 }
  0x2c   : > { %v346_v34 = vld [vmem:[%s896_s5 + $0x8] sm:$0xff] (!%p271_p10)  ;;  %v348_v35 = vld [vmem:[%s896_s5 + $0x18] sm:$0xff] (!%p271_p10)  ;;  %v345_v36 = vld [vmem:[%s896_s5] sm:$0xff] (!%p271_p10)  ;;  %p323_p11 = scmp.lt.s32.totalorder (!%p271_p10), %s655_s10, 3  ;;  %s654_s20 = sshll.u32 (!%p271_p10), %s277_s30, 5 }
  0x2d   : > { %v378_v37 = vpack.c.bf16 (!%p271_p10), %v348_v35, %v346_v34  ;;  %v347_v38 = vld [vmem:[%s896_s5 + $0x10] sm:$0xff] (!%p271_p10)  ;;  %v350_v39 = vld [vmem:[%s896_s5 + $0x28] sm:$0xff] (!%p271_p10)  ;;  %v352_v40 = vld [vmem:[%s896_s5 + $0x38] sm:$0xff] (!%p271_p10)  ;;  %v455_v23 = vsub.s32 (!%p271_p10), 0, %v454_v22  ;;  %v459_v25 = vsub.s32 (!%p271_p10), 1, %v454_v22  ;;  %s310_s23 = scalar_lea.vmem (!%p271_p10), [#allocation4], %s654_s20 }
  0x2e   : > { %v377_v41 = vpack.c.bf16 (!%p271_p10), %v347_v38, %v345_v36  ;;  %v380_v42 = vpack.c.bf16 (!%p271_p10), %v352_v40, %v350_v39  ;;  %v349_v43 = vld [vmem:[%s896_s5 + $0x20] sm:$0xff] (!%p271_p10)  ;;  %v351_v44 = vld [vmem:[%s896_s5 + $0x30] sm:$0xff] (!%p271_p10)  ;;  %v354_v45 = vld [vmem:[%s896_s5 + $0x48] sm:$0xff] (!%p271_p10) }
  0x2f   : > { %393 = vmatprep.subr.bf16.mxu0 (!%p271_p10), %v378_v37  ;;  %v356_v46 = vld [vmem:[%s896_s5 + $0x58] sm:$0xff] (!%p271_p10)  ;;  %v379_v47 = vpack.c.bf16 (!%p271_p10), %v351_v44, %v349_v43  ;;  %v353_v49 = vld [vmem:[%s896_s5 + $0x40] sm:$0xff] (!%p271_p10)  ;;  %v355_v50 = vld [vmem:[%s896_s5 + $0x50] sm:$0xff] (!%p271_p10) }
  0x30   : > { %394 = vmatpush1.bf16.msra.mxu0 (!%p271_p10), %v377_v41  ;;  %v382_v48 = vpack.c.bf16 (!%p271_p10), %v356_v46, %v354_v45  ;;  %v358_v51 = vld [vmem:[%s896_s5 + $0x68] sm:$0xff] (!%p271_p10)  ;;  %v360_v52 = vld [vmem:[%s896_s5 + $0x78] sm:$0xff] (!%p271_p10)  ;;  %v381_v53 = vpack.c.bf16 (!%p271_p10), %v355_v50, %v353_v49  ;;  %v357_v55 = vld [vmem:[%s896_s5 + $0x60] sm:$0xff] (!%p271_p10) }
  0x31   : > { %395 = vmatprep.subr.bf16.mxu0 %v380_v42  ;;  %v384_v54 = vpack.c.bf16 %v360_v52, %v358_v51  ;;  %v359_v56 = vld [vmem:[%s896_s5 + $0x70] sm:$0xff]  ;;  %v362_v57 = vld [vmem:[%s896_s5 + $0x88] sm:$0xff]  ;;  %v364_v58 = vld [vmem:[%s896_s5 + $0x98] sm:$0xff]  ;;  %s975_s10 = smov (!%p323_p11, %s655_s10), 3  ;;  %s662_s12 = sshll.u32 (%p810_p6), %s743_s14, 4 }
  0x32   : > { %v383_v59 = vpack.c.bf16 %v359_v56, %v357_v55  ;;  %v386_v60 = vpack.c.bf16 %v364_v58, %v362_v57  ;;  %v361_v61 = vld [vmem:[%s896_s5 + $0x80] sm:$0xff]  ;;  %v363_v62 = vld [vmem:[%s896_s5 + $0x90] sm:$0xff]  ;;  %v366_v63 = vld [vmem:[%s896_s5 + $0xa8] sm:$0xff]  ;;  %s325_s19 = scalar_lea.vmem %s965_s2, %s975_s10  ;;  %s519_s26 = scalar_lea.vmem (%p810_p6), %s966_s3, %s662_s12 }
  0x33   : > { %v368_v0 = vld [vmem:[%s896_s5 + $0xb8] sm:$0xff]  ;;  %v385_v1 = vpack.c.bf16 %v363_v62, %v361_v61  ;;  %v365_v3 = vld [vmem:[%s896_s5 + $0xa0] sm:$0xff]  ;;  %v367_v4 = vld [vmem:[%s896_s5 + $0xb0] sm:$0xff] }
  0x34   : > { %396 = vmatpush1.bf16.msra.mxu0 %v379_v47  ;;  %v388_v2 = vpack.c.bf16 %v368_v0, %v366_v63  ;;  %v370_v5 = vld [vmem:[%s896_s5 + $0xc8] sm:$0xff]  ;;  %v372_v6 = vld [vmem:[%s896_s5 + $0xd8] sm:$0xff]  ;;  %v387_v7 = vpack.c.bf16 %v367_v4, %v365_v3  ;;  %v369_v9 = vld [vmem:[%s896_s5 + $0xc0] sm:$0xff] }
  0x35   : > { %397 = vmatprep.subr.bf16.mxu0 %v382_v48  ;;  %v390_v8 = vpack.c.bf16 %v372_v6, %v370_v5  ;;  %v371_v10 = vld [vmem:[%s896_s5 + $0xd0] sm:$0xff]  ;;  %v374_v11 = vld [vmem:[%s896_s5 + $0xe8] sm:$0xff]  ;;  %v376_v12 = vld [vmem:[%s896_s5 + $0xf8] sm:$0xff] }
  0x36   : > { %v389_v13 = vpack.c.bf16 %v371_v10, %v369_v9  ;;  %v392_v14 = vpack.c.bf16 %v376_v12, %v374_v11  ;;  %v373_v15 = vld [vmem:[%s896_s5 + $0xe0] sm:$0xff]  ;;  %v375_v16 = vld [vmem:[%s896_s5 + $0xf0] sm:$0xff]  ;;  %v341_v31 = vld [vmem:[#allocation2 + $0x18] sm:$0x3] }
  0x37   : > { %v391_v17 = vpack.c.bf16 %v375_v16, %v373_v15  ;;  %v451_v24 = vld [vmem:[%s325_s19] sm:$0x3]  ;;  %v340_v29 = vld [vmem:[#allocation2 + $0x10] sm:$0x3] }
  0x38   : > { %398 = vmatpush1.bf16.msra.mxu0 %v381_v53  ;;  %v456_v26 = vrot.slane %v451_v24, %v455_v23  ;;  %v460_v28 = vrot.slane %v451_v24, %v459_v25 }
  0x39   : > { %399 = vmatprep.subr.bf16.mxu0 %v384_v54 }
  0x3c   : > { %400 = vmatpush1.bf16.msra.mxu0 %v383_v59 }
  0x3d   : > { %401 = vmatprep.subr.bf16.mxu0 %v386_v60 }
  0x40   : > { %402 = vmatpush1.bf16.msra.mxu0 %v385_v1 }
  0x41   : > { %403 = vmatprep.subr.bf16.mxu0 %v388_v2 }
  0x44   : > { %404 = vmatpush1.bf16.msra.mxu0 %v387_v7 }
  0x45   : > { %405 = vmatprep.subr.bf16.mxu0 %v390_v8 }
  0x48   : > { %406 = vmatpush1.bf16.msra.mxu0 %v389_v13 }
  0x49   : > { %407 = vmatprep.subr.bf16.mxu0 %v392_v14 }
  0x4c   : > { %408 = vmatpush1.bf16.msra.mxu0 %v391_v17 }
  0x4f   : > { %426 = vmatmul.mubr.bf16.vlgmr.msra.gmra.mrb[0].mxu0 %v344_v20 }
 0x122   : > { %v427_v27 = vpop.f32.mrb[0].mxu0 }
 0x123   : > { %v429_v30 = vpop.f32.mrb[1].mxu0  ;;  %v463_v33 = vadd.f32 %v456_v26, %v427_v27 }
 0x124   : > { %v431_v32 = vpop.f32.mrb[2].mxu0  ;;  %v464_v36 = vadd.f32 %v460_v28, %v429_v30 }
 0x125   : > { %v438_v34 = vadd.f32 %v431_v32, %v340_v29  ;;  %v433_v35 = vpop.f32.mrb[3].mxu0  ;;  %v471_v38 = vmul.f32 0.044715, %v463_v33  ;;  %v467_v0 = vmul.f32 0.5, %v463_v33 }
 0x126   : > { %v439_v37 = vadd.f32 %v433_v35, %v341_v31  ;;  %v472_v39 = vmul.f32 0.044715, %v464_v36  ;;  %v468_v2 = vmul.f32 0.5, %v464_v36 }
 0x127   : > { %442 = vst [vmem:[#allocation2 + $0x10] sm:$0x3] %v438_v34  ;;  %v475_v40 = vmul.f32 %v471_v38, %v463_v33 }
 0x128   : > { %443 = vst [vmem:[#allocation2 + $0x18] sm:$0x3] %v439_v37  ;;  %v476_v41 = vmul.f32 %v472_v39, %v464_v36 }
 0x129   : > { %v479_v42 = vmul.f32 %v475_v40, %v463_v33 }
 0x12a   : > { %v480_v43 = vmul.f32 %v476_v41, %v464_v36 }
 0x12b   : > { %v483_v44 = vadd.f32 %v479_v42, %v463_v33 }
 0x12c   : > { %v484_v45 = vadd.f32 %v480_v43, %v464_v36 }
 0x12d   : > { %v487_v47 = vmul.f32 0.7978846, %v483_v44 }
 0x12e   : > { %v449_v46 = vld [vmem:[#allocation2 + $0x10] sm:$0x3]  ;;  %v488_v50 = vmul.f32 0.7978846, %v484_v45 }
 0x12f   : > { %v465_v48 = vadd.f32 %v456_v26, %v449_v46  ;;  %v450_v49 = vld [vmem:[#allocation2 + $0x18] sm:$0x3]  ;;  %705 = vtanh.f32 %v487_v47 }
 0x130   : > { %v466_v51 = vadd.f32 %v460_v28, %v450_v49  ;;  %707 = vtanh.f32 %v488_v50 }
 0x131   : > { %v473_v52 = vmul.f32 0.044715, %v465_v48  ;;  %v469_v8 = vmul.f32 0.5, %v465_v48 }
 0x132   : > { %v474_v53 = vmul.f32 0.044715, %v466_v51  ;;  %v470_v10 = vmul.f32 0.5, %v466_v51 }
 0x133   : > { %v477_v54 = vmul.f32 %v473_v52, %v465_v48 }
 0x134   : > { %v478_v55 = vmul.f32 %v474_v53, %v466_v51 }
 0x135   : > { %v481_v56 = vmul.f32 %v477_v54, %v465_v48 }
 0x136   : > { %v482_v57 = vmul.f32 %v478_v55, %v466_v51 }
 0x137   : > { %v485_v58 = vadd.f32 %v481_v56, %v465_v48 }
 0x138   : > { %v486_v59 = vadd.f32 %v482_v57, %v466_v51 }
 0x139   : > { %v489_v60 = vmul.f32 0.7978846, %v485_v58  ;;  %v706_v62 = vpop.eup %705 }
 0x13a   : > { %v490_v61 = vmul.f32 0.7978846, %v486_v59  ;;  %v708_v63 = vpop.eup %707  ;;  %v495_v1 = vadd.f32 1.0, %v706_v62 }
 0x13b   : > { %709 = vtanh.f32 %v489_v60  ;;  %v496_v3 = vadd.f32 1.0, %v708_v63 }
 0x13c   : > { %711 = vtanh.f32 %v490_v61  ;;  %v499_v4 = vmul.f32 %v495_v1, %v467_v0 }
 0x13d   : > { %v500_v5 = vmul.f32 %v496_v3, %v468_v2 }
 0x13e   : > { %503 = vst [vmem:[%s310_s23] sm:$0xff] %v499_v4 }
 0x13f   : > { %504 = vst [vmem:[%s310_s23 + $0x8] sm:$0xff] %v500_v5 }
 0x145   : > { %v710_v6 = vpop.eup %709  ;;  %513 = sbr.rel (!%p810_p6) target bundleno = 340 (0x154), region = 67  ;;  %v532_v14 = vld [vmem:[%s310_s23] sm:$0xff] (%p810_p6) }
 0x146   : > { %v712_v7 = vpop.eup %711  ;;  %v497_v9 = vadd.f32 1.0, %v710_v6  ;;  %v534_v15 = vld [vmem:[%s310_s23 + $0x8] sm:$0xff] (%p810_p6)  ;;  %533 = vst [vmem:[%s519_s26] sm:$0xff] (%p810_p6), %v532_v14 }
 0x147   : > { %v498_v11 = vadd.f32 1.0, %v712_v7  ;;  %535 = vst [vmem:[%s519_s26 + $0x8] sm:$0xff] (%p810_p6), %v534_v15 }
 0x148   : > { %v501_v12 = vmul.f32 %v497_v9, %v469_v8 }
 0x149   : > { %v502_v13 = vmul.f32 %v498_v11, %v470_v10 }
 0x14a   : > { %505 = vst [vmem:[%s310_s23 + $0x10] sm:$0x3] %v501_v12 }
 0x14b   : > { %506 = vst [vmem:[%s310_s23 + $0x18] sm:$0x3] %v502_v13 }
 0x151   : > { %v536_v16 = vld [vmem:[%s310_s23 + $0x10] sm:$0xff] }
 0x152   : > { %v538_v17 = vld [vmem:[%s310_s23 + $0x18] sm:$0xff]  ;;  %537 = vst [vmem:[%s519_s26 + $0x20] sm:$0xff] %v536_v16 }
 0x153   : > { %539 = vst [vmem:[%s519_s26 + $0x28] sm:$0xff] %v538_v17 }
 0x154 PF: > { %s13_s16 = sadd.s32 1, %s751_s16   ;;  %s968_s12 = smov %s739_s13 }
 0x155   : > { %p10_p12 = scmp.ge.s32.totalorder %s13_s16, 4   ;;  %s969_s13 = smov %s815_s22 }
 0x156   : > { %s970_s14 = smov %s747_s15  ;;  %s971_s15 = smov %s973_s17 }
 0x157   :  { %12 = sbr.rel (!%p10_p12) target bundleno = 3 (0x3), region = 127 }

// kernel: fwd.34
= control target key start
LH: loop header
LB: loop body
LE: loop exit
PB: predicated region body
PF: predicated region fallthrough
CT: control target
= control target key end

     0   :  { %vm15_vm0 = vcmask 1041408   ;;  %s87_s0 = inlined_call_operand.vmem [shape: f32[2,128], index: 0, kind: input, shape index: {}]   ;;  %s88_s1 = inlined_call_operand.vmem [shape: f32[1,128], index: 1, kind: input, shape index: {}]   ;;  %s89_s2 = inlined_call_operand.vmem [shape: f32[1,128], index: 2, kind: input, shape index: {}]   ;;  %s90_s3 = inlined_call_operand.vmem [shape: f32[2,128], index: 3, kind: output, shape index: {}]  }
   0x1   :  { %v14_v0 = vld [vmem:[%s87_s0] sm:$0x3] }
   0x2   :  { %v16_v1 = vsel %vm15_vm0, %v14_v0, 0.0  ;;  %v51_v11 = vld [vmem:[%s88_s1] ss:$0 sm:$0xff] }
   0x3   :  { %17 = vadd.xlane.f32.xlu0 %v16_v1  ;;  %v52_v13 = vld [vmem:[%s89_s2] ss:$0 sm:$0xff] }
  0x90   :  { %v18_v2 = vpop.xlane.xlu0 %17 }
  0x91   :  { %v20_v3 = vmul.f32 0.0078125, %v18_v2 }
  0x93   :  { %v21_v4 = vsub.f32 %v14_v0, %v20_v3 }
  0x95   :  { %v22_v5 = vmul.f32 %v21_v4, %v21_v4 }
  0x97   :  { %v23_v6 = vsel %vm15_vm0, %v22_v5, 0.0 }
  0x98   :  { %24 = vadd.xlane.f32.xlu0 %v23_v6 }
 0x125   :  { %v25_v7 = vpop.xlane.xlu0 %24 }
 0x126   :  { %v26_v8 = vmul.f32 0.0078125, %v25_v7 }
 0x128   :  { %v27_v9 = vadd.f32 1e-05, %v26_v8 }
 0x12a   :  { %53 = vrsqrt.f32 %v27_v9 }
 0x134   :  { %v54_v10 = vpop.eup %53 }
 0x135   :  { %v29_v12 = vmul.f32 %v54_v10, %v21_v4 }
 0x137   :  { %v37_v14 = vmul.f32 %v51_v11, %v29_v12 }
 0x139   :  { %v45_v15 = vadd.f32 %v52_v13, %v37_v14 }
 0x13b   :  { %46 = vst [vmem:[%s90_s3] sm:$0x3] %v45_v15 }

// kernel: fwd.35
= control target key start
LH: loop header
LB: loop body
LE: loop exit
PB: predicated region body
PF: predicated region fallthrough
CT: control target
= control target key end

     0   :  { %v161_v3 = vmov 0.0   ;;  %vm162_vm0 = vmmov 0   ;;  %s250_s0 = inlined_call_operand.vmem [shape: f32[2,128], index: 0, kind: input, shape index: {}]   ;;  %s251_s1 = inlined_call_operand.vmem [shape: f32[128,128], index: 1, kind: input, shape index: {}]   ;;  %s252_s2 = inlined_call_operand.vmem [shape: f32[1,128], index: 2, kind: input, shape index: {}]   ;;  %s253_s3 = inlined_call_operand.hbm [shape: f32[2,128], index: 3, kind: output, shape index: {}]  }
   0x1   :  { %v18_v0 = vld [vmem:[%s251_s1] sm:$0xff]  ;;  %v19_v1 = vld [vmem:[%s251_s1 + $0x8] sm:$0xff]  ;;  %v20_v2 = vld [vmem:[%s251_s1 + $0x10] sm:$0xff]  ;;  %114 = vmatprep.subr.bf16.mxu0 %v161_v3  ;;  %130 = vmatprep.mubr.msk.bf16.mxu0 %vm162_vm0, %v161_v3 }
   0x2   :  { %v34_v4 = vpack.c.bf16 %v19_v1, %v18_v0  ;;  %v21_v5 = vld [vmem:[%s251_s1 + $0x18] sm:$0xff]  ;;  %v22_v7 = vld [vmem:[%s251_s1 + $0x20] sm:$0xff]  ;;  %v23_v8 = vld [vmem:[%s251_s1 + $0x28] sm:$0xff] }
   0x3   :  { %v35_v6 = vpack.c.bf16 %v21_v5, %v20_v2 }
   0x4   :  { %115 = vmatpush3.bf16.msra.mxu0 %v34_v4 }
   0x5   :  { %116 = vmatprep.subr.bf16.mxu0 %v161_v3 }
   0x6   :  { %8 = vsyncpa [#allocation3], 0  ;;  %v36_v9 = vpack.c.bf16 %v23_v8, %v22_v7  ;;  %v24_v10 = vld [vmem:[%s251_s1 + $0x30] sm:$0xff]  ;;  %v25_v11 = vld [vmem:[%s251_s1 + $0x38] sm:$0xff]  ;;  %s163_s21 = smov [#allocation2]  }
   0x7   :  { %v37_v12 = vpack.c.bf16 %v25_v11, %v24_v10  ;;  %v26_v13 = vld [vmem:[%s251_s1 + $0x40] sm:$0xff]  ;;  %v27_v14 = vld [vmem:[%s251_s1 + $0x48] sm:$0xff]  ;;  %v28_v16 = vld [vmem:[%s251_s1 + $0x50] sm:$0xff]  ;;  %s96_s22 = sshll.u32 %s163_s21, 4  ;;  %s97_s22 = int_to_ptr.vmem [resolvable:$true] %s96_s22 }
   0x8   :  { %117 = vmatpush3.bf16.msra.mxu0 %v35_v6  ;;  %v38_v15 = vpack.c.bf16 %v27_v14, %v26_v13  ;;  %v29_v17 = vld [vmem:[%s251_s1 + $0x58] sm:$0xff]  ;;  %v30_v19 = vld [vmem:[%s251_s1 + $0x60] sm:$0xff]  ;;  %v31_v20 = vld [vmem:[%s251_s1 + $0x68] sm:$0xff]  ;;  %p142_p1 = scmp.lt.s32.totalorder %s97_s22, %s97_s22 }
   0x9   :  { %118 = vmatprep.subr.bf16.mxu0 %v161_v3  ;;  %v39_v18 = vpack.c.bf16 %v29_v17, %v28_v16  ;;  %v40_v21 = vpack.c.bf16 %v31_v20, %v30_v19  ;;  %v32_v22 = vld [vmem:[%s251_s1 + $0x70] sm:$0xff]  ;;  %v33_v23 = vld [vmem:[%s251_s1 + $0x78] sm:$0xff]  ;;  %v16_v25 = vld [vmem:[%s250_s0] sm:$0x3]  ;;  %s137_s1 = scalar_lea.vmem %s97_s22, 32 }
   0xa   :  { %v41_v24 = vpack.c.bf16 %v33_v23, %v32_v22  ;;  %v17_v26 = vpack.c.bf16 %v16_v25, %v16_v25  ;;  %v104_v27 = vld [vmem:[%s252_s2] ss:$0 sm:$0xff]  ;;  %p138_p0 = scmp.ne.s32.totalorder %s97_s22, %s137_s1  ;;  %p143_p2 = scmp.lt.s32.totalorder %s137_s1, %s137_s1 }
   0xc   :  { %119 = vmatpush3.bf16.msra.mxu0 %v36_v9  ;;  %p144_p3 = por %p143_p2, %p142_p1 }
   0xd   :  { %120 = vmatprep.subr.bf16.mxu0 %v161_v3 }
   0xe   :  { %p145_p4 = pnand %p144_p3, %p138_p0 }
  0x10   :  { %121 = vmatpush3.bf16.msra.mxu0 %v37_v12 }
  0x11   :  { %122 = vmatprep.subr.bf16.mxu0 %v161_v3 }
  0x14   :  { %123 = vmatpush3.bf16.msra.mxu0 %v38_v15 }
  0x15   :  { %124 = vmatprep.subr.bf16.mxu0 %v161_v3 }
  0x18   :  { %125 = vmatpush3.bf16.msra.mxu0 %v39_v18 }
  0x19   :  { %126 = vmatprep.subr.bf16.mxu0 %v161_v3 }
  0x1c   :  { %127 = vmatpush3.bf16.msra.mxu0 %v40_v21 }
  0x1d   :  { %128 = vmatprep.subr.bf16.mxu0 %v161_v3 }
  0x20   :  { %129 = vmatpush3.bf16.msra.mxu0 %v41_v24 }
  0x23   :  { %131 = vmatmul.mubr.bf16.vlgmr.msra.gmra.mrb[0].mxu0 %v17_v26 }
  0xf6   :  { %v83_v28 = vpop.f32.mrb[0].mxu0 }
  0xf7   :  { %v84_v29 = vadd.f32 %v104_v27, %v83_v28  ;;  %v132_v30 = vpop.f32.mrb[1].mxu0 }
  0xf8   :  { %v86_v31 = vpop.f32.mrb[2].mxu0 }
  0xf9   :  { %89 = vst [vmem:[#allocation2] sm:$0x3] %v84_v29  ;;  %v133_v32 = vpop.f32.mrb[3].mxu0 }
  0xfa   :  { %148 = shalt.err (!%p145_p4)
}
  0xfb   :  { %s149_s2 = scalar_lea.hbm %s253_s3, 32 }
  0xfc   :  { %p150_p5 = scmp.ne.s32.totalorder %s253_s3, %s149_s2  ;;  %p153_p6 = scmp.lt.u32.totalorder %s149_s2, %s253_s3 }
  0xfe   :  { %p155_p7 = pnand %p153_p6, %p150_p5 }
 0x100   :  { %158 = shalt.err (!%p155_p7)
}
 0x101   :  { %99 = dma.vmem_to_hbm [thread:$0]  %s97_s22, 32, %s253_s3, [#allocation3]  }
 0x102   :  { %159 = dma.done.wait [#allocation3], 32  }
 0x103   :  { %160 = vsyncadd [#allocation3], 4294967264 }
 0x104   :  { %103 = vsyncpa [#allocation3], 1 }

</bundles_post_ra>
